<compile_context>
chip_gen: v7x
topology: tpu7x:2x2x1
jax: 0.10.0
libtpu: 0.0.40
codegen_flags: <defaults>
</compile_context>

<pallas_src>
import functools
import math

import jax
import jax.numpy as jnp
from jax.experimental import pallas as pl
from jax.experimental.pallas import tpu as pltpu


# ----------------------------------------------------------------------------
# Kernel
# ----------------------------------------------------------------------------
def _t_encoder_kernel(x_ref, wq_ref, wk_ref, wv_ref, wo_ref, bo_ref,
                      w1_ref, b1_ref, w2_ref, b2_ref, gamma_ref, beta_ref,
                      o_ref,
                      q_s, k_s, v_s, ctx_s,
                      *, heads, head_dim, seq_t, groups):
    f32 = jnp.float32
    x = x_ref[...].astype(f32)                                   # (R, C), R = groups*T

    # --- QKV projections: big dense MXU matmuls over all rows in the block ---
    q_s[...] = jnp.dot(x, wq_ref[...].astype(f32), preferred_element_type=f32)
    k_s[...] = jnp.dot(x, wk_ref[...].astype(f32), preferred_element_type=f32)
    v_s[...] = jnp.dot(x, wv_ref[...].astype(f32), preferred_element_type=f32)

    scale = 1.0 / math.sqrt(head_dim)

    # --- scaled dot-product attention, independent per (group, head) ---------
    for g in range(groups):
        r0 = g * seq_t
        for h in range(heads):
            c0 = h * head_dim
            qh = q_s[r0:r0 + seq_t, c0:c0 + head_dim]            # (T, Dh)
            kh = k_s[r0:r0 + seq_t, c0:c0 + head_dim]            # (T, Dh)
            vh = v_s[r0:r0 + seq_t, c0:c0 + head_dim]            # (T, Dh)
            # scores = q @ k^T / sqrt(Dh)                         (T, T)
            s = jax.lax.dot_general(qh, kh, (((1,), (1,)), ((), ())),
                                    preferred_element_type=f32) * scale
            s = s - jnp.max(s, axis=-1, keepdims=True)
            e = jnp.exp(s)
            p = e / jnp.sum(e, axis=-1, keepdims=True)
            ctx_s[r0:r0 + seq_t, c0:c0 + head_dim] = jnp.dot(
                p, vh, preferred_element_type=f32)

    ctx = ctx_s[...]                                             # (R, C)

    # --- attention output projection -----------------------------------------
    attn_out = (jnp.dot(ctx, wo_ref[...].astype(f32), preferred_element_type=f32)
                + bo_ref[...].astype(f32))

    # --- position-wise FFN with residual -------------------------------------
    h1 = (jnp.dot(attn_out, w1_ref[...].astype(f32), preferred_element_type=f32)
          + b1_ref[...].astype(f32))
    h1 = jnp.maximum(h1, 0.0)
    h2 = (jnp.dot(h1, w2_ref[...].astype(f32), preferred_element_type=f32)
          + b2_ref[...].astype(f32))
    y = h2 + attn_out

    # --- LayerNorm over the embedding axis ------------------------------------
    mu = jnp.mean(y, axis=-1, keepdims=True)
    var = jnp.mean(jnp.square(y - mu), axis=-1, keepdims=True)
    yn = (y - mu) * jax.lax.rsqrt(var + 1e-5)
    out = yn * gamma_ref[...].astype(f32) + beta_ref[...].astype(f32)

    o_ref[...] = out.astype(o_ref.dtype)


# ----------------------------------------------------------------------------
# Block-size selection
# ----------------------------------------------------------------------------
def _pick_block_groups(num_groups, seq_t, embed):
    """Pick how many (b, n) groups each grid step processes.

    Constraints: block rows = g*T must be a multiple of 8 unless the block is
    the full row extent; keep the widest f32 intermediate (rows, 4C) under
    ~2 MiB; prefer >= 2 grid blocks so v7x megacore can split the work.
    """
    cap_rows = max(seq_t, (2 * 1024 * 1024) // (4 * embed * 4))
    target_rows = min(1024, cap_rows)
    divisors = [g for g in range(1, num_groups + 1) if num_groups % g == 0]
    ok = [g for g in divisors if (g * seq_t) % 8 == 0 or g == num_groups]
    pref = [g for g in ok if g * seq_t <= target_rows and (num_groups // g) >= 2]
    if pref:
        return max(pref)
    fits = [g for g in ok if g * seq_t <= target_rows]
    if fits:
        return max(fits)
    return min(ok)


# ----------------------------------------------------------------------------
# Wrapper
# ----------------------------------------------------------------------------
def t_encoder_layer(x, params, *, heads, block_groups=None):
    """Forward pass of TEncoderLayer for x of shape (B, N, T, C)."""
    B, N, T, C = x.shape
    assert C % heads == 0, "embed_size must be divisible by heads"
    head_dim = C // heads
    G = B * N
    if block_groups is None:
        block_groups = _pick_block_groups(G, T, C)
    assert G % block_groups == 0
    R = block_groups * T                                        # rows per block

    x2 = x.reshape(G * T, C)

    row_map = lambda i: (i, 0)
    fixed = lambda i: (0, 0)

    kernel = functools.partial(_t_encoder_kernel, heads=heads,
                               head_dim=head_dim, seq_t=T, groups=block_groups)

    out2 = pl.pallas_call(
        kernel,
        out_shape=jax.ShapeDtypeStruct((G * T, C), x.dtype),
        grid_spec=pltpu.PrefetchScalarGridSpec(
            num_scalar_prefetch=0,
            grid=(G // block_groups,),
            in_specs=[
                pl.BlockSpec((R, C), row_map),          # x rows
                pl.BlockSpec((C, C), fixed),            # W_Q
                pl.BlockSpec((C, C), fixed),            # W_K
                pl.BlockSpec((C, C), fixed),            # W_V
                pl.BlockSpec((C, C), fixed),            # W_O (fc_out)
                pl.BlockSpec((1, C), fixed),            # b_O
                pl.BlockSpec((C, 4 * C), fixed),        # FFN W1
                pl.BlockSpec((1, 4 * C), fixed),        # FFN b1
                pl.BlockSpec((4 * C, C), fixed),        # FFN W2
                pl.BlockSpec((1, C), fixed),            # FFN b2
                pl.BlockSpec((1, C), fixed),            # LayerNorm gamma
                pl.BlockSpec((1, C), fixed),            # LayerNorm beta
            ],
            out_specs=pl.BlockSpec((R, C), row_map),
            scratch_shapes=[pltpu.VMEM((R, C), jnp.float32)] * 4,  # q, k, v, ctx
        ),
        compiler_params=pltpu.CompilerParams(
            dimension_semantics=("parallel",),
            vmem_limit_bytes=48 * 1024 * 1024,   # safe on v5e/v6e (128 MiB) and v7x (64 MiB)
        ),
    )(x2, params["wq"], params["wk"], params["wv"], params["wo"], params["bo"],
      params["w1"], params["b1"], params["w2"], params["b2"],
      params["gamma"], params["beta"])

    return out2.reshape(B, N, T, C)


# ----------------------------------------------------------------------------
# Pure-JAX reference (mirrors the PyTorch module exactly)
# ----------------------------------------------------------------------------
def reference_forward(x, p, heads):
    B, N, T, C = x.shape
    Dh = C // heads
    hp = jax.lax.Precision.HIGHEST

    q = jnp.einsum('...c,cd->...d', x, p['wq'], precision=hp)
    k = jnp.einsum('...c,cd->...d', x, p['wk'], precision=hp)
    v = jnp.einsum('...c,cd->...d', x, p['wv'], precision=hp)

    def split(t):   # (B,N,T,C) -> (B,H,N,T,Dh)
        return t.reshape(B, N, T, heads, Dh).transpose(0, 3, 1, 2, 4)

    qh, kh, vh = split(q), split(k), split(v)
    scores = jnp.einsum('bhnts,bhnus->bhntu', qh, kh, precision=hp) / math.sqrt(Dh)
    attn = jax.nn.softmax(scores, axis=-1)
    ctx = jnp.einsum('bhntu,bhnus->bhnts', attn, vh, precision=hp)
    ctx = ctx.transpose(0, 2, 3, 1, 4).reshape(B, N, T, C)

    out = jnp.einsum('...c,cd->...d', ctx, p['wo'], precision=hp) + p['bo'].reshape(C)
    h1 = jax.nn.relu(jnp.einsum('...c,cd->...d', out, p['w1'], precision=hp)
                     + p['b1'].reshape(4 * C))
    h2 = jnp.einsum('...c,cd->...d', h1, p['w2'], precision=hp) + p['b2'].reshape(C)
    y = h2 + out
    mu = y.mean(-1, keepdims=True)
    var = jnp.mean(jnp.square(y - mu), -1, keepdims=True)
    yn = (y - mu) / jnp.sqrt(var + 1e-5)
    return yn * p['gamma'].reshape(C) + p['beta'].reshape(C)


# ----------------------------------------------------------------------------
# Demo / self-test
# ----------------------------------------------------------------------------
if __name__ == "__main__":
    B, N, T, C, H = 2, 3, 12, 32, 4   # T=12 matches the module's docstring

    key = jax.random.PRNGKey(0)
    keys = jax.random.split(key, 12)

    def w(k, shape, fan_in):
        return jax.random.normal(k, shape, jnp.float32) / math.sqrt(fan_in)

    params = dict(
        wq=w(keys[0], (C, C), C),
        wk=w(keys[1], (C, C), C),
        wv=w(keys[2], (C, C), C),
        wo=w(keys[3], (C, C), C),
        bo=0.02 * jax.random.normal(keys[4], (1, C), jnp.float32),
        w1=w(keys[5], (C, 4 * C), C),
        b1=0.02 * jax.random.normal(keys[6], (1, 4 * C), jnp.float32),
        w2=w(keys[7], (4 * C, C), 4 * C),
        b2=0.02 * jax.random.normal(keys[8], (1, C), jnp.float32),
        gamma=1.0 + 0.1 * jax.random.normal(keys[9], (1, C), jnp.float32),
        beta=0.05 * jax.random.normal(keys[10], (1, C), jnp.float32),
    )
    x = jax.random.normal(keys[11], (B, N, T, C), jnp.float32)

    out = t_encoder_layer(x, params, heads=H)
    out = jax.block_until_ready(out)

    ref = reference_forward(x, params, H)
    assert out.shape == (B, N, T, C)
    assert out.dtype == x.dtype
    max_err = float(jnp.max(jnp.abs(out - ref)))
    assert jnp.allclose(out, ref, atol=2e-4, rtol=2e-4), f"max abs err = {max_err}"

    print("KERNEL_OK")
</pallas_src>

<mosaic_0001>
module attributes {stable_mosaic.version = 11 : i64} {
  func.func @_t_encoder_kernel(%arg0: i32, %arg1: memref<24x32xf32, #tpu.memory_space<vmem>>, %arg2: memref<32x32xf32, #tpu.memory_space<vmem>>, %arg3: memref<32x32xf32, #tpu.memory_space<vmem>>, %arg4: memref<32x32xf32, #tpu.memory_space<vmem>>, %arg5: memref<32x32xf32, #tpu.memory_space<vmem>>, %arg6: memref<1x32xf32, #tpu.memory_space<vmem>>, %arg7: memref<32x128xf32, #tpu.memory_space<vmem>>, %arg8: memref<1x128xf32, #tpu.memory_space<vmem>>, %arg9: memref<128x32xf32, #tpu.memory_space<vmem>>, %arg10: memref<1x32xf32, #tpu.memory_space<vmem>>, %arg11: memref<1x32xf32, #tpu.memory_space<vmem>>, %arg12: memref<1x32xf32, #tpu.memory_space<vmem>>, %arg13: memref<24x32xf32, #tpu.memory_space<vmem>>, %arg14: memref<24x32xf32, #tpu.memory_space<vmem>>, %arg15: memref<24x32xf32, #tpu.memory_space<vmem>>, %arg16: memref<24x32xf32, #tpu.memory_space<vmem>>, %arg17: memref<24x32xf32, #tpu.memory_space<vmem>>) attributes {dimension_semantics = [#tpu.dimension_semantics<parallel>], iteration_bounds = array<i64: 3>, scalar_prefetch = 0 : i64, scratch_operands = 4 : i64, tpu.core_type = #tpu.core_type<tc>, window_params = [{transform_indices = @transform_0, window_bounds = array<i64: 24, 32>}, {pipeline_mode = #tpu.pipeline_mode<synchronous>, transform_indices = @transform_1, window_bounds = array<i64: 32, 32>}, {pipeline_mode = #tpu.pipeline_mode<synchronous>, transform_indices = @transform_2, window_bounds = array<i64: 32, 32>}, {pipeline_mode = #tpu.pipeline_mode<synchronous>, transform_indices = @transform_3, window_bounds = array<i64: 32, 32>}, {pipeline_mode = #tpu.pipeline_mode<synchronous>, transform_indices = @transform_4, window_bounds = array<i64: 32, 32>}, {pipeline_mode = #tpu.pipeline_mode<synchronous>, transform_indices = @transform_5, window_bounds = array<i64: 1, 32>}, {pipeline_mode = #tpu.pipeline_mode<synchronous>, transform_indices = @transform_6, window_bounds = array<i64: 32, 128>}, {pipeline_mode = #tpu.pipeline_mode<synchronous>, transform_indices = @transform_7, window_bounds = array<i64: 1, 128>}, {pipeline_mode = #tpu.pipeline_mode<synchronous>, transform_indices = @transform_8, window_bounds = array<i64: 128, 32>}, {pipeline_mode = #tpu.pipeline_mode<synchronous>, transform_indices = @transform_9, window_bounds = array<i64: 1, 32>}, {pipeline_mode = #tpu.pipeline_mode<synchronous>, transform_indices = @transform_10, window_bounds = array<i64: 1, 32>}, {pipeline_mode = #tpu.pipeline_mode<synchronous>, transform_indices = @transform_11, window_bounds = array<i64: 1, 32>}, {transform_indices = @transform_12, window_bounds = array<i64: 24, 32>}]} {
    %c0 = arith.constant 0 : index
    %c0_0 = arith.constant 0 : index
    %0 = vector.load %arg1[%c0, %c0_0] : memref<24x32xf32, #tpu.memory_space<vmem>>, vector<24x32xf32>
    %c0_1 = arith.constant 0 : index
    %c0_2 = arith.constant 0 : index
    %1 = vector.load %arg2[%c0_1, %c0_2] : memref<32x32xf32, #tpu.memory_space<vmem>>, vector<32x32xf32>
    %cst = arith.constant dense<0.000000e+00> : vector<24x32xf32>
    %2 = tpu.matmul %0, %1, %cst {dimension_numbers = #tpu.dot_dimension_numbers<[1], [0], [0], [1], [0, 0, 1, 1], [], []>} : vector<24x32xf32>, vector<32x32xf32>, vector<24x32xf32> -> vector<24x32xf32>
    %c0_3 = arith.constant 0 : index
    %c0_4 = arith.constant 0 : index
    %3 = vector.load %arg14[%c0_3, %c0_4] : memref<24x32xf32, #tpu.memory_space<vmem>>, vector<24x32xf32>
    tpu.vector_store %arg14[%c0_3, %c0_4], %2 {strides = array<i32>} : memref<24x32xf32, #tpu.memory_space<vmem>>, vector<24x32xf32>,
    %c0_5 = arith.constant 0 : index
    %c0_6 = arith.constant 0 : index
    %4 = vector.load %arg3[%c0_5, %c0_6] : memref<32x32xf32, #tpu.memory_space<vmem>>, vector<32x32xf32>
    %cst_7 = arith.constant dense<0.000000e+00> : vector<24x32xf32>
    %5 = tpu.matmul %0, %4, %cst_7 {dimension_numbers = #tpu.dot_dimension_numbers<[1], [0], [0], [1], [0, 0, 1, 1], [], []>} : vector<24x32xf32>, vector<32x32xf32>, vector<24x32xf32> -> vector<24x32xf32>
    %c0_8 = arith.constant 0 : index
    %c0_9 = arith.constant 0 : index
    %6 = vector.load %arg15[%c0_8, %c0_9] : memref<24x32xf32, #tpu.memory_space<vmem>>, vector<24x32xf32>
    tpu.vector_store %arg15[%c0_8, %c0_9], %5 {strides = array<i32>} : memref<24x32xf32, #tpu.memory_space<vmem>>, vector<24x32xf32>,
    %c0_10 = arith.constant 0 : index
    %c0_11 = arith.constant 0 : index
    %7 = vector.load %arg4[%c0_10, %c0_11] : memref<32x32xf32, #tpu.memory_space<vmem>>, vector<32x32xf32>
    %cst_12 = arith.constant dense<0.000000e+00> : vector<24x32xf32>
    %8 = tpu.matmul %0, %7, %cst_12 {dimension_numbers = #tpu.dot_dimension_numbers<[1], [0], [0], [1], [0, 0, 1, 1], [], []>} : vector<24x32xf32>, vector<32x32xf32>, vector<24x32xf32> -> vector<24x32xf32>
    %c0_13 = arith.constant 0 : index
    %c0_14 = arith.constant 0 : index
    %9 = vector.load %arg16[%c0_13, %c0_14] : memref<24x32xf32, #tpu.memory_space<vmem>>, vector<24x32xf32>
    tpu.vector_store %arg16[%c0_13, %c0_14], %8 {strides = array<i32>} : memref<24x32xf32, #tpu.memory_space<vmem>>, vector<24x32xf32>,
    %c0_15 = arith.constant 0 : index
    %c0_16 = arith.constant 0 : index
    %10 = vector.load %arg14[%c0_15, %c0_16] : memref<24x32xf32, #tpu.memory_space<vmem>>, vector<12x8xf32>
    %c0_17 = arith.constant 0 : index
    %c0_18 = arith.constant 0 : index
    %11 = vector.load %arg15[%c0_17, %c0_18] : memref<24x32xf32, #tpu.memory_space<vmem>>, vector<12x8xf32>
    %c0_19 = arith.constant 0 : index
    %c0_20 = arith.constant 0 : index
    %12 = vector.load %arg16[%c0_19, %c0_20] : memref<24x32xf32, #tpu.memory_space<vmem>>, vector<12x8xf32>
    %cst_21 = arith.constant dense<0.000000e+00> : vector<12x12xf32>
    %13 = tpu.matmul %10, %11, %cst_21 {dimension_numbers = #tpu.dot_dimension_numbers<[1], [1], [0], [0], [0, 0, 1, 0], [], []>} : vector<12x8xf32>, vector<12x8xf32>, vector<12x12xf32> -> vector<12x12xf32>
    %cst_22 = arith.constant 0.353553385 : f32
    %14 = vector.broadcast %cst_22 : f32 to vector<12x12xf32>
    %15 = arith.mulf %13, %14 : vector<12x12xf32>
    %cst_23 = arith.constant dense<0xFF800000> : vector<12xf32>
    %16 = vector.multi_reduction <maximumf>, %15, %cst_23 [1] : vector<12x12xf32> to vector<12xf32>
    %17 = vector.shape_cast %16 : vector<12xf32> to vector<12x1xf32>
    %18 = vector.broadcast %17 : vector<12x1xf32> to vector<12x12xf32>
    %19 = arith.subf %15, %18 : vector<12x12xf32>
    %20 = math.exp %19 : vector<12x12xf32>
    %cst_24 = arith.constant dense<0.000000e+00> : vector<12xf32>
    %21 = vector.multi_reduction <add>, %20, %cst_24 [1] : vector<12x12xf32> to vector<12xf32>
    %22 = vector.shape_cast %21 : vector<12xf32> to vector<12x1xf32>
    %23 = vector.broadcast %22 : vector<12x1xf32> to vector<12x12xf32>
    %24 = arith.divf %20, %23 : vector<12x12xf32>
    %cst_25 = arith.constant dense<0.000000e+00> : vector<12x8xf32>
    %25 = tpu.matmul %24, %12, %cst_25 {dimension_numbers = #tpu.dot_dimension_numbers<[1], [0], [0], [1], [0, 0, 1, 1], [], []>} : vector<12x12xf32>, vector<12x8xf32>, vector<12x8xf32> -> vector<12x8xf32>
    %c0_26 = arith.constant 0 : index
    %c0_27 = arith.constant 0 : index
    %26 = vector.load %arg17[%c0_26, %c0_27] : memref<24x32xf32, #tpu.memory_space<vmem>>, vector<12x8xf32>
    tpu.vector_store %arg17[%c0_26, %c0_27], %25 {strides = array<i32>} : memref<24x32xf32, #tpu.memory_space<vmem>>, vector<12x8xf32>,
    %c0_28 = arith.constant 0 : index
    %c8 = arith.constant 8 : index
    %27 = vector.load %arg14[%c0_28, %c8] : memref<24x32xf32, #tpu.memory_space<vmem>>, vector<12x8xf32>
    %c0_29 = arith.constant 0 : index
    %c8_30 = arith.constant 8 : index
    %28 = vector.load %arg15[%c0_29, %c8_30] : memref<24x32xf32, #tpu.memory_space<vmem>>, vector<12x8xf32>
    %c0_31 = arith.constant 0 : index
    %c8_32 = arith.constant 8 : index
    %29 = vector.load %arg16[%c0_31, %c8_32] : memref<24x32xf32, #tpu.memory_space<vmem>>, vector<12x8xf32>
    %cst_33 = arith.constant dense<0.000000e+00> : vector<12x12xf32>
    %30 = tpu.matmul %27, %28, %cst_33 {dimension_numbers = #tpu.dot_dimension_numbers<[1], [1], [0], [0], [0, 0, 1, 0], [], []>} : vector<12x8xf32>, vector<12x8xf32>, vector<12x12xf32> -> vector<12x12xf32>
    %cst_34 = arith.constant 0.353553385 : f32
    %31 = vector.broadcast %cst_34 : f32 to vector<12x12xf32>
    %32 = arith.mulf %30, %31 : vector<12x12xf32>
    %cst_35 = arith.constant dense<0xFF800000> : vector<12xf32>
    %33 = vector.multi_reduction <maximumf>, %32, %cst_35 [1] : vector<12x12xf32> to vector<12xf32>
    %34 = vector.shape_cast %33 : vector<12xf32> to vector<12x1xf32>
    %35 = vector.broadcast %34 : vector<12x1xf32> to vector<12x12xf32>
    %36 = arith.subf %32, %35 : vector<12x12xf32>
    %37 = math.exp %36 : vector<12x12xf32>
    %cst_36 = arith.constant dense<0.000000e+00> : vector<12xf32>
    %38 = vector.multi_reduction <add>, %37, %cst_36 [1] : vector<12x12xf32> to vector<12xf32>
    %39 = vector.shape_cast %38 : vector<12xf32> to vector<12x1xf32>
    %40 = vector.broadcast %39 : vector<12x1xf32> to vector<12x12xf32>
    %41 = arith.divf %37, %40 : vector<12x12xf32>
    %cst_37 = arith.constant dense<0.000000e+00> : vector<12x8xf32>
    %42 = tpu.matmul %41, %29, %cst_37 {dimension_numbers = #tpu.dot_dimension_numbers<[1], [0], [0], [1], [0, 0, 1, 1], [], []>} : vector<12x12xf32>, vector<12x8xf32>, vector<12x8xf32> -> vector<12x8xf32>
    %c0_38 = arith.constant 0 : index
    %c8_39 = arith.constant 8 : index
    %43 = vector.load %arg17[%c0_38, %c8_39] : memref<24x32xf32, #tpu.memory_space<vmem>>, vector<12x8xf32>
    tpu.vector_store %arg17[%c0_38, %c8_39], %42 {strides = array<i32>} : memref<24x32xf32, #tpu.memory_space<vmem>>, vector<12x8xf32>,
    %c0_40 = arith.constant 0 : index
    %c16 = arith.constant 16 : index
    %44 = vector.load %arg14[%c0_40, %c16] : memref<24x32xf32, #tpu.memory_space<vmem>>, vector<12x8xf32>
    %c0_41 = arith.constant 0 : index
    %c16_42 = arith.constant 16 : index
    %45 = vector.load %arg15[%c0_41, %c16_42] : memref<24x32xf32, #tpu.memory_space<vmem>>, vector<12x8xf32>
    %c0_43 = arith.constant 0 : index
    %c16_44 = arith.constant 16 : index
    %46 = vector.load %arg16[%c0_43, %c16_44] : memref<24x32xf32, #tpu.memory_space<vmem>>, vector<12x8xf32>
    %cst_45 = arith.constant dense<0.000000e+00> : vector<12x12xf32>
    %47 = tpu.matmul %44, %45, %cst_45 {dimension_numbers = #tpu.dot_dimension_numbers<[1], [1], [0], [0], [0, 0, 1, 0], [], []>} : vector<12x8xf32>, vector<12x8xf32>, vector<12x12xf32> -> vector<12x12xf32>
    %cst_46 = arith.constant 0.353553385 : f32
    %48 = vector.broadcast %cst_46 : f32 to vector<12x12xf32>
    %49 = arith.mulf %47, %48 : vector<12x12xf32>
    %cst_47 = arith.constant dense<0xFF800000> : vector<12xf32>
    %50 = vector.multi_reduction <maximumf>, %49, %cst_47 [1] : vector<12x12xf32> to vector<12xf32>
    %51 = vector.shape_cast %50 : vector<12xf32> to vector<12x1xf32>
    %52 = vector.broadcast %51 : vector<12x1xf32> to vector<12x12xf32>
    %53 = arith.subf %49, %52 : vector<12x12xf32>
    %54 = math.exp %53 : vector<12x12xf32>
    %cst_48 = arith.constant dense<0.000000e+00> : vector<12xf32>
    %55 = vector.multi_reduction <add>, %54, %cst_48 [1] : vector<12x12xf32> to vector<12xf32>
    %56 = vector.shape_cast %55 : vector<12xf32> to vector<12x1xf32>
    %57 = vector.broadcast %56 : vector<12x1xf32> to vector<12x12xf32>
    %58 = arith.divf %54, %57 : vector<12x12xf32>
    %cst_49 = arith.constant dense<0.000000e+00> : vector<12x8xf32>
    %59 = tpu.matmul %58, %46, %cst_49 {dimension_numbers = #tpu.dot_dimension_numbers<[1], [0], [0], [1], [0, 0, 1, 1], [], []>} : vector<12x12xf32>, vector<12x8xf32>, vector<12x8xf32> -> vector<12x8xf32>
    %c0_50 = arith.constant 0 : index
    %c16_51 = arith.constant 16 : index
    %60 = vector.load %arg17[%c0_50, %c16_51] : memref<24x32xf32, #tpu.memory_space<vmem>>, vector<12x8xf32>
    tpu.vector_store %arg17[%c0_50, %c16_51], %59 {strides = array<i32>} : memref<24x32xf32, #tpu.memory_space<vmem>>, vector<12x8xf32>,
    %c0_52 = arith.constant 0 : index
    %c24 = arith.constant 24 : index
    %61 = vector.load %arg14[%c0_52, %c24] : memref<24x32xf32, #tpu.memory_space<vmem>>, vector<12x8xf32>
    %c0_53 = arith.constant 0 : index
    %c24_54 = arith.constant 24 : index
    %62 = vector.load %arg15[%c0_53, %c24_54] : memref<24x32xf32, #tpu.memory_space<vmem>>, vector<12x8xf32>
    %c0_55 = arith.constant 0 : index
    %c24_56 = arith.constant 24 : index
    %63 = vector.load %arg16[%c0_55, %c24_56] : memref<24x32xf32, #tpu.memory_space<vmem>>, vector<12x8xf32>
    %cst_57 = arith.constant dense<0.000000e+00> : vector<12x12xf32>
    %64 = tpu.matmul %61, %62, %cst_57 {dimension_numbers = #tpu.dot_dimension_numbers<[1], [1], [0], [0], [0, 0, 1, 0], [], []>} : vector<12x8xf32>, vector<12x8xf32>, vector<12x12xf32> -> vector<12x12xf32>
    %cst_58 = arith.constant 0.353553385 : f32
    %65 = vector.broadcast %cst_58 : f32 to vector<12x12xf32>
    %66 = arith.mulf %64, %65 : vector<12x12xf32>
    %cst_59 = arith.constant dense<0xFF800000> : vector<12xf32>
    %67 = vector.multi_reduction <maximumf>, %66, %cst_59 [1] : vector<12x12xf32> to vector<12xf32>
    %68 = vector.shape_cast %67 : vector<12xf32> to vector<12x1xf32>
    %69 = vector.broadcast %68 : vector<12x1xf32> to vector<12x12xf32>
    %70 = arith.subf %66, %69 : vector<12x12xf32>
    %71 = math.exp %70 : vector<12x12xf32>
    %cst_60 = arith.constant dense<0.000000e+00> : vector<12xf32>
    %72 = vector.multi_reduction <add>, %71, %cst_60 [1] : vector<12x12xf32> to vector<12xf32>
    %73 = vector.shape_cast %72 : vector<12xf32> to vector<12x1xf32>
    %74 = vector.broadcast %73 : vector<12x1xf32> to vector<12x12xf32>
    %75 = arith.divf %71, %74 : vector<12x12xf32>
    %cst_61 = arith.constant dense<0.000000e+00> : vector<12x8xf32>
    %76 = tpu.matmul %75, %63, %cst_61 {dimension_numbers = #tpu.dot_dimension_numbers<[1], [0], [0], [1], [0, 0, 1, 1], [], []>} : vector<12x12xf32>, vector<12x8xf32>, vector<12x8xf32> -> vector<12x8xf32>
    %c0_62 = arith.constant 0 : index
    %c24_63 = arith.constant 24 : index
    %77 = vector.load %arg17[%c0_62, %c24_63] : memref<24x32xf32, #tpu.memory_space<vmem>>, vector<12x8xf32>
    tpu.vector_store %arg17[%c0_62, %c24_63], %76 {strides = array<i32>} : memref<24x32xf32, #tpu.memory_space<vmem>>, vector<12x8xf32>,
    %c12 = arith.constant 12 : index
    %c0_64 = arith.constant 0 : index
    %78 = vector.load %arg14[%c12, %c0_64] : memref<24x32xf32, #tpu.memory_space<vmem>>, vector<12x8xf32>
    %c12_65 = arith.constant 12 : index
    %c0_66 = arith.constant 0 : index
    %79 = vector.load %arg15[%c12_65, %c0_66] : memref<24x32xf32, #tpu.memory_space<vmem>>, vector<12x8xf32>
    %c12_67 = arith.constant 12 : index
    %c0_68 = arith.constant 0 : index
    %80 = vector.load %arg16[%c12_67, %c0_68] : memref<24x32xf32, #tpu.memory_space<vmem>>, vector<12x8xf32>
    %cst_69 = arith.constant dense<0.000000e+00> : vector<12x12xf32>
    %81 = tpu.matmul %78, %79, %cst_69 {dimension_numbers = #tpu.dot_dimension_numbers<[1], [1], [0], [0], [0, 0, 1, 0], [], []>} : vector<12x8xf32>, vector<12x8xf32>, vector<12x12xf32> -> vector<12x12xf32>
    %cst_70 = arith.constant 0.353553385 : f32
    %82 = vector.broadcast %cst_70 : f32 to vector<12x12xf32>
    %83 = arith.mulf %81, %82 : vector<12x12xf32>
    %cst_71 = arith.constant dense<0xFF800000> : vector<12xf32>
    %84 = vector.multi_reduction <maximumf>, %83, %cst_71 [1] : vector<12x12xf32> to vector<12xf32>
    %85 = vector.shape_cast %84 : vector<12xf32> to vector<12x1xf32>
    %86 = vector.broadcast %85 : vector<12x1xf32> to vector<12x12xf32>
    %87 = arith.subf %83, %86 : vector<12x12xf32>
    %88 = math.exp %87 : vector<12x12xf32>
    %cst_72 = arith.constant dense<0.000000e+00> : vector<12xf32>
    %89 = vector.multi_reduction <add>, %88, %cst_72 [1] : vector<12x12xf32> to vector<12xf32>
    %90 = vector.shape_cast %89 : vector<12xf32> to vector<12x1xf32>
    %91 = vector.broadcast %90 : vector<12x1xf32> to vector<12x12xf32>
    %92 = arith.divf %88, %91 : vector<12x12xf32>
    %cst_73 = arith.constant dense<0.000000e+00> : vector<12x8xf32>
    %93 = tpu.matmul %92, %80, %cst_73 {dimension_numbers = #tpu.dot_dimension_numbers<[1], [0], [0], [1], [0, 0, 1, 1], [], []>} : vector<12x12xf32>, vector<12x8xf32>, vector<12x8xf32> -> vector<12x8xf32>
    %c12_74 = arith.constant 12 : index
    %c0_75 = arith.constant 0 : index
    %94 = vector.load %arg17[%c12_74, %c0_75] : memref<24x32xf32, #tpu.memory_space<vmem>>, vector<12x8xf32>
    tpu.vector_store %arg17[%c12_74, %c0_75], %93 {strides = array<i32>} : memref<24x32xf32, #tpu.memory_space<vmem>>, vector<12x8xf32>,
    %c12_76 = arith.constant 12 : index
    %c8_77 = arith.constant 8 : index
    %95 = vector.load %arg14[%c12_76, %c8_77] : memref<24x32xf32, #tpu.memory_space<vmem>>, vector<12x8xf32>
    %c12_78 = arith.constant 12 : index
    %c8_79 = arith.constant 8 : index
    %96 = vector.load %arg15[%c12_78, %c8_79] : memref<24x32xf32, #tpu.memory_space<vmem>>, vector<12x8xf32>
    %c12_80 = arith.constant 12 : index
    %c8_81 = arith.constant 8 : index
    %97 = vector.load %arg16[%c12_80, %c8_81] : memref<24x32xf32, #tpu.memory_space<vmem>>, vector<12x8xf32>
    %cst_82 = arith.constant dense<0.000000e+00> : vector<12x12xf32>
    %98 = tpu.matmul %95, %96, %cst_82 {dimension_numbers = #tpu.dot_dimension_numbers<[1], [1], [0], [0], [0, 0, 1, 0], [], []>} : vector<12x8xf32>, vector<12x8xf32>, vector<12x12xf32> -> vector<12x12xf32>
    %cst_83 = arith.constant 0.353553385 : f32
    %99 = vector.broadcast %cst_83 : f32 to vector<12x12xf32>
    %100 = arith.mulf %98, %99 : vector<12x12xf32>
    %cst_84 = arith.constant dense<0xFF800000> : vector<12xf32>
    %101 = vector.multi_reduction <maximumf>, %100, %cst_84 [1] : vector<12x12xf32> to vector<12xf32>
    %102 = vector.shape_cast %101 : vector<12xf32> to vector<12x1xf32>
    %103 = vector.broadcast %102 : vector<12x1xf32> to vector<12x12xf32>
    %104 = arith.subf %100, %103 : vector<12x12xf32>
    %105 = math.exp %104 : vector<12x12xf32>
    %cst_85 = arith.constant dense<0.000000e+00> : vector<12xf32>
    %106 = vector.multi_reduction <add>, %105, %cst_85 [1] : vector<12x12xf32> to vector<12xf32>
    %107 = vector.shape_cast %106 : vector<12xf32> to vector<12x1xf32>
    %108 = vector.broadcast %107 : vector<12x1xf32> to vector<12x12xf32>
    %109 = arith.divf %105, %108 : vector<12x12xf32>
    %cst_86 = arith.constant dense<0.000000e+00> : vector<12x8xf32>
    %110 = tpu.matmul %109, %97, %cst_86 {dimension_numbers = #tpu.dot_dimension_numbers<[1], [0], [0], [1], [0, 0, 1, 1], [], []>} : vector<12x12xf32>, vector<12x8xf32>, vector<12x8xf32> -> vector<12x8xf32>
    %c12_87 = arith.constant 12 : index
    %c8_88 = arith.constant 8 : index
    %111 = vector.load %arg17[%c12_87, %c8_88] : memref<24x32xf32, #tpu.memory_space<vmem>>, vector<12x8xf32>
    tpu.vector_store %arg17[%c12_87, %c8_88], %110 {strides = array<i32>} : memref<24x32xf32, #tpu.memory_space<vmem>>, vector<12x8xf32>,
    %c12_89 = arith.constant 12 : index
    %c16_90 = arith.constant 16 : index
    %112 = vector.load %arg14[%c12_89, %c16_90] : memref<24x32xf32, #tpu.memory_space<vmem>>, vector<12x8xf32>
    %c12_91 = arith.constant 12 : index
    %c16_92 = arith.constant 16 : index
    %113 = vector.load %arg15[%c12_91, %c16_92] : memref<24x32xf32, #tpu.memory_space<vmem>>, vector<12x8xf32>
    %c12_93 = arith.constant 12 : index
    %c16_94 = arith.constant 16 : index
    %114 = vector.load %arg16[%c12_93, %c16_94] : memref<24x32xf32, #tpu.memory_space<vmem>>, vector<12x8xf32>
    %cst_95 = arith.constant dense<0.000000e+00> : vector<12x12xf32>
    %115 = tpu.matmul %112, %113, %cst_95 {dimension_numbers = #tpu.dot_dimension_numbers<[1], [1], [0], [0], [0, 0, 1, 0], [], []>} : vector<12x8xf32>, vector<12x8xf32>, vector<12x12xf32> -> vector<12x12xf32>
    %cst_96 = arith.constant 0.353553385 : f32
    %116 = vector.broadcast %cst_96 : f32 to vector<12x12xf32>
    %117 = arith.mulf %115, %116 : vector<12x12xf32>
    %cst_97 = arith.constant dense<0xFF800000> : vector<12xf32>
    %118 = vector.multi_reduction <maximumf>, %117, %cst_97 [1] : vector<12x12xf32> to vector<12xf32>
    %119 = vector.shape_cast %118 : vector<12xf32> to vector<12x1xf32>
    %120 = vector.broadcast %119 : vector<12x1xf32> to vector<12x12xf32>
    %121 = arith.subf %117, %120 : vector<12x12xf32>
    %122 = math.exp %121 : vector<12x12xf32>
    %cst_98 = arith.constant dense<0.000000e+00> : vector<12xf32>
    %123 = vector.multi_reduction <add>, %122, %cst_98 [1] : vector<12x12xf32> to vector<12xf32>
    %124 = vector.shape_cast %123 : vector<12xf32> to vector<12x1xf32>
    %125 = vector.broadcast %124 : vector<12x1xf32> to vector<12x12xf32>
    %126 = arith.divf %122, %125 : vector<12x12xf32>
    %cst_99 = arith.constant dense<0.000000e+00> : vector<12x8xf32>
    %127 = tpu.matmul %126, %114, %cst_99 {dimension_numbers = #tpu.dot_dimension_numbers<[1], [0], [0], [1], [0, 0, 1, 1], [], []>} : vector<12x12xf32>, vector<12x8xf32>, vector<12x8xf32> -> vector<12x8xf32>
    %c12_100 = arith.constant 12 : index
    %c16_101 = arith.constant 16 : index
    %128 = vector.load %arg17[%c12_100, %c16_101] : memref<24x32xf32, #tpu.memory_space<vmem>>, vector<12x8xf32>
    tpu.vector_store %arg17[%c12_100, %c16_101], %127 {strides = array<i32>} : memref<24x32xf32, #tpu.memory_space<vmem>>, vector<12x8xf32>,
    %c12_102 = arith.constant 12 : index
    %c24_103 = arith.constant 24 : index
    %129 = vector.load %arg14[%c12_102, %c24_103] : memref<24x32xf32, #tpu.memory_space<vmem>>, vector<12x8xf32>
    %c12_104 = arith.constant 12 : index
    %c24_105 = arith.constant 24 : index
    %130 = vector.load %arg15[%c12_104, %c24_105] : memref<24x32xf32, #tpu.memory_space<vmem>>, vector<12x8xf32>
    %c12_106 = arith.constant 12 : index
    %c24_107 = arith.constant 24 : index
    %131 = vector.load %arg16[%c12_106, %c24_107] : memref<24x32xf32, #tpu.memory_space<vmem>>, vector<12x8xf32>
    %cst_108 = arith.constant dense<0.000000e+00> : vector<12x12xf32>
    %132 = tpu.matmul %129, %130, %cst_108 {dimension_numbers = #tpu.dot_dimension_numbers<[1], [1], [0], [0], [0, 0, 1, 0], [], []>} : vector<12x8xf32>, vector<12x8xf32>, vector<12x12xf32> -> vector<12x12xf32>
    %cst_109 = arith.constant 0.353553385 : f32
    %133 = vector.broadcast %cst_109 : f32 to vector<12x12xf32>
    %134 = arith.mulf %132, %133 : vector<12x12xf32>
    %cst_110 = arith.constant dense<0xFF800000> : vector<12xf32>
    %135 = vector.multi_reduction <maximumf>, %134, %cst_110 [1] : vector<12x12xf32> to vector<12xf32>
    %136 = vector.shape_cast %135 : vector<12xf32> to vector<12x1xf32>
    %137 = vector.broadcast %136 : vector<12x1xf32> to vector<12x12xf32>
    %138 = arith.subf %134, %137 : vector<12x12xf32>
    %139 = math.exp %138 : vector<12x12xf32>
    %cst_111 = arith.constant dense<0.000000e+00> : vector<12xf32>
    %140 = vector.multi_reduction <add>, %139, %cst_111 [1] : vector<12x12xf32> to vector<12xf32>
    %141 = vector.shape_cast %140 : vector<12xf32> to vector<12x1xf32>
    %142 = vector.broadcast %141 : vector<12x1xf32> to vector<12x12xf32>
    %143 = arith.divf %139, %142 : vector<12x12xf32>
    %cst_112 = arith.constant dense<0.000000e+00> : vector<12x8xf32>
    %144 = tpu.matmul %143, %131, %cst_112 {dimension_numbers = #tpu.dot_dimension_numbers<[1], [0], [0], [1], [0, 0, 1, 1], [], []>} : vector<12x12xf32>, vector<12x8xf32>, vector<12x8xf32> -> vector<12x8xf32>
    %c12_113 = arith.constant 12 : index
    %c24_114 = arith.constant 24 : index
    %145 = vector.load %arg17[%c12_113, %c24_114] : memref<24x32xf32, #tpu.memory_space<vmem>>, vector<12x8xf32>
    tpu.vector_store %arg17[%c12_113, %c24_114], %144 {strides = array<i32>} : memref<24x32xf32, #tpu.memory_space<vmem>>, vector<12x8xf32>,
    %c0_115 = arith.constant 0 : index
    %c0_116 = arith.constant 0 : index
    %146 = vector.load %arg17[%c0_115, %c0_116] : memref<24x32xf32, #tpu.memory_space<vmem>>, vector<24x32xf32>
    %c0_117 = arith.constant 0 : index
    %c0_118 = arith.constant 0 : index
    %147 = vector.load %arg5[%c0_117, %c0_118] : memref<32x32xf32, #tpu.memory_space<vmem>>, vector<32x32xf32>
    %cst_119 = arith.constant dense<0.000000e+00> : vector<24x32xf32>
    %148 = tpu.matmul %146, %147, %cst_119 {dimension_numbers = #tpu.dot_dimension_numbers<[1], [0], [0], [1], [0, 0, 1, 1], [], []>} : vector<24x32xf32>, vector<32x32xf32>, vector<24x32xf32> -> vector<24x32xf32>
    %c0_120 = arith.constant 0 : index
    %c0_121 = arith.constant 0 : index
    %149 = vector.load %arg6[%c0_120, %c0_121] : memref<1x32xf32, #tpu.memory_space<vmem>>, vector<1x32xf32>
    %150 = vector.broadcast %149 : vector<1x32xf32> to vector<24x32xf32>
    %151 = arith.addf %148, %150 : vector<24x32xf32>
    %c0_122 = arith.constant 0 : index
    %c0_123 = arith.constant 0 : index
    %152 = vector.load %arg7[%c0_122, %c0_123] : memref<32x128xf32, #tpu.memory_space<vmem>>, vector<32x128xf32>
    %cst_124 = arith.constant dense<0.000000e+00> : vector<24x128xf32>
    %153 = tpu.matmul %151, %152, %cst_124 {dimension_numbers = #tpu.dot_dimension_numbers<[1], [0], [0], [1], [0, 0, 1, 1], [], []>} : vector<24x32xf32>, vector<32x128xf32>, vector<24x128xf32> -> vector<24x128xf32>
    %c0_125 = arith.constant 0 : index
    %c0_126 = arith.constant 0 : index
    %154 = vector.load %arg8[%c0_125, %c0_126] : memref<1x128xf32, #tpu.memory_space<vmem>>, vector<1x128xf32>
    %155 = vector.broadcast %154 : vector<1x128xf32> to vector<24x128xf32>
    %156 = arith.addf %153, %155 : vector<24x128xf32>
    %cst_127 = arith.constant 0.000000e+00 : f32
    %157 = vector.broadcast %cst_127 : f32 to vector<24x128xf32>
    %158 = arith.maximumf %156, %157 : vector<24x128xf32>
    %c0_128 = arith.constant 0 : index
    %c0_129 = arith.constant 0 : index
    %159 = vector.load %arg9[%c0_128, %c0_129] : memref<128x32xf32, #tpu.memory_space<vmem>>, vector<128x32xf32>
    %cst_130 = arith.constant dense<0.000000e+00> : vector<24x32xf32>
    %160 = tpu.matmul %158, %159, %cst_130 {dimension_numbers = #tpu.dot_dimension_numbers<[1], [0], [0], [1], [0, 0, 1, 1], [], []>} : vector<24x128xf32>, vector<128x32xf32>, vector<24x32xf32> -> vector<24x32xf32>
    %c0_131 = arith.constant 0 : index
    %c0_132 = arith.constant 0 : index
    %161 = vector.load %arg10[%c0_131, %c0_132] : memref<1x32xf32, #tpu.memory_space<vmem>>, vector<1x32xf32>
    %162 = vector.broadcast %161 : vector<1x32xf32> to vector<24x32xf32>
    %163 = arith.addf %160, %162 : vector<24x32xf32>
    %164 = arith.addf %163, %151 : vector<24x32xf32>
    %cst_133 = arith.constant dense<0.000000e+00> : vector<24xf32>
    %165 = vector.multi_reduction <add>, %164, %cst_133 [1] : vector<24x32xf32> to vector<24xf32>
    %166 = vector.shape_cast %165 : vector<24xf32> to vector<24x1xf32>
    %cst_134 = arith.constant 3.200000e+01 : f32
    %167 = vector.broadcast %cst_134 : f32 to vector<24x1xf32>
    %168 = arith.divf %166, %167 : vector<24x1xf32>
    %169 = vector.broadcast %168 : vector<24x1xf32> to vector<24x32xf32>
    %170 = arith.subf %164, %169 : vector<24x32xf32>
    %171 = arith.mulf %170, %170 : vector<24x32xf32>
    %cst_135 = arith.constant dense<0.000000e+00> : vector<24xf32>
    %172 = vector.multi_reduction <add>, %171, %cst_135 [1] : vector<24x32xf32> to vector<24xf32>
    %173 = vector.shape_cast %172 : vector<24xf32> to vector<24x1xf32>
    %cst_136 = arith.constant 3.200000e+01 : f32
    %174 = vector.broadcast %cst_136 : f32 to vector<24x1xf32>
    %175 = arith.divf %173, %174 : vector<24x1xf32>
    %176 = vector.broadcast %168 : vector<24x1xf32> to vector<24x32xf32>
    %177 = arith.subf %164, %176 : vector<24x32xf32>
    %cst_137 = arith.constant 9.99999974E-6 : f32
    %178 = vector.broadcast %cst_137 : f32 to vector<24x1xf32>
    %179 = arith.addf %175, %178 : vector<24x1xf32>
    %180 = math.rsqrt %179 : vector<24x1xf32>
    %181 = vector.broadcast %180 : vector<24x1xf32> to vector<24x32xf32>
    %182 = arith.mulf %177, %181 : vector<24x32xf32>
    %c0_138 = arith.constant 0 : index
    %c0_139 = arith.constant 0 : index
    %183 = vector.load %arg11[%c0_138, %c0_139] : memref<1x32xf32, #tpu.memory_space<vmem>>, vector<1x32xf32>
    %184 = vector.broadcast %183 : vector<1x32xf32> to vector<24x32xf32>
    %185 = arith.mulf %182, %184 : vector<24x32xf32>
    %c0_140 = arith.constant 0 : index
    %c0_141 = arith.constant 0 : index
    %186 = vector.load %arg12[%c0_140, %c0_141] : memref<1x32xf32, #tpu.memory_space<vmem>>, vector<1x32xf32>
    %187 = vector.broadcast %186 : vector<1x32xf32> to vector<24x32xf32>
    %188 = arith.addf %185, %187 : vector<24x32xf32>
    %c0_142 = arith.constant 0 : index
    %c0_143 = arith.constant 0 : index
    %189 = vector.load %arg13[%c0_142, %c0_143] : memref<24x32xf32, #tpu.memory_space<vmem>>, vector<24x32xf32>
    tpu.vector_store %arg13[%c0_142, %c0_143], %188 {strides = array<i32>} : memref<24x32xf32, #tpu.memory_space<vmem>>, vector<24x32xf32>,
    return
  }
  func.func @transform_0(%arg0: i32) -> (i32, i32) {
    %c0_i32 = arith.constant 0 : i32
    %c0_i32_0 = arith.constant 0 : i32
    return %arg0, %c0_i32 : i32, i32
  }
  func.func @transform_1(%arg0: i32) -> (i32, i32) {
    %c0_i32 = arith.constant 0 : i32
    %c0_i32_0 = arith.constant 0 : i32
    %c0_i32_1 = arith.constant 0 : i32
    return %c0_i32, %c0_i32_0 : i32, i32
  }
  func.func @transform_2(%arg0: i32) -> (i32, i32) {
    %c0_i32 = arith.constant 0 : i32
    %c0_i32_0 = arith.constant 0 : i32
    %c0_i32_1 = arith.constant 0 : i32
    return %c0_i32, %c0_i32_0 : i32, i32
  }
  func.func @transform_3(%arg0: i32) -> (i32, i32) {
    %c0_i32 = arith.constant 0 : i32
    %c0_i32_0 = arith.constant 0 : i32
    %c0_i32_1 = arith.constant 0 : i32
    return %c0_i32, %c0_i32_0 : i32, i32
  }
  func.func @transform_4(%arg0: i32) -> (i32, i32) {
    %c0_i32 = arith.constant 0 : i32
    %c0_i32_0 = arith.constant 0 : i32
    %c0_i32_1 = arith.constant 0 : i32
    return %c0_i32, %c0_i32_0 : i32, i32
  }
  func.func @transform_5(%arg0: i32) -> (i32, i32) {
    %c0_i32 = arith.constant 0 : i32
    %c0_i32_0 = arith.constant 0 : i32
    %c0_i32_1 = arith.constant 0 : i32
    return %c0_i32, %c0_i32_0 : i32, i32
  }
  func.func @transform_6(%arg0: i32) -> (i32, i32) {
    %c0_i32 = arith.constant 0 : i32
    %c0_i32_0 = arith.constant 0 : i32
    %c0_i32_1 = arith.constant 0 : i32
    return %c0_i32, %c0_i32_0 : i32, i32
  }
  func.func @transform_7(%arg0: i32) -> (i32, i32) {
    %c0_i32 = arith.constant 0 : i32
    %c0_i32_0 = arith.constant 0 : i32
    %c0_i32_1 = arith.constant 0 : i32
    return %c0_i32, %c0_i32_0 : i32, i32
  }
  func.func @transform_8(%arg0: i32) -> (i32, i32) {
    %c0_i32 = arith.constant 0 : i32
    %c0_i32_0 = arith.constant 0 : i32
    %c0_i32_1 = arith.constant 0 : i32
    return %c0_i32, %c0_i32_0 : i32, i32
  }
  func.func @transform_9(%arg0: i32) -> (i32, i32) {
    %c0_i32 = arith.constant 0 : i32
    %c0_i32_0 = arith.constant 0 : i32
    %c0_i32_1 = arith.constant 0 : i32
    return %c0_i32, %c0_i32_0 : i32, i32
  }
  func.func @transform_10(%arg0: i32) -> (i32, i32) {
    %c0_i32 = arith.constant 0 : i32
    %c0_i32_0 = arith.constant 0 : i32
    %c0_i32_1 = arith.constant 0 : i32
    return %c0_i32, %c0_i32_0 : i32, i32
  }
  func.func @transform_11(%arg0: i32) -> (i32, i32) {
    %c0_i32 = arith.constant 0 : i32
    %c0_i32_0 = arith.constant 0 : i32
    %c0_i32_1 = arith.constant 0 : i32
    return %c0_i32, %c0_i32_0 : i32, i32
  }
  func.func @transform_12(%arg0: i32) -> (i32, i32) {
    %c0_i32 = arith.constant 0 : i32
    %c0_i32_0 = arith.constant 0 : i32
    return %arg0, %c0_i32 : i32, i32
  }
}

</mosaic_0001>

<bundles_post_ra>
// kernel: tpu_custom_call.1
= control target key start
LH: loop header
LB: loop body
LE: loop exit
PB: predicated region body
PF: predicated region fallthrough
CT: control target
= control target key end

     0   :  { %s3711_s21 = smov 0   ;;  %s4203_s0 = inlined_call_operand.vmem [shape: f32[72,32], index: 0, kind: input, shape index: {}]   ;;  %s4204_s1 = inlined_call_operand.vmem [shape: f32[32,32], index: 1, kind: input, shape index: {}]   ;;  %s4205_s2 = inlined_call_operand.vmem [shape: f32[32,32], index: 2, kind: input, shape index: {}]   ;;  %s4206_s3 = inlined_call_operand.vmem [shape: f32[32,32], index: 3, kind: input, shape index: {}]   ;;  %s4207_s4 = inlined_call_operand.vmem [shape: f32[32,32], index: 4, kind: input, shape index: {}]   ;;  %s4208_s5 = inlined_call_operand.vmem [shape: f32[1,32], index: 5, kind: input, shape index: {}]   ;;  %s4209_s6 = inlined_call_operand.vmem [shape: f32[32,128], index: 6, kind: input, shape index: {}]   ;;  %s4210_s7 = inlined_call_operand.vmem [shape: f32[1,128], index: 7, kind: input, shape index: {}]   ;;  %s4211_s8 = inlined_call_operand.vmem [shape: f32[128,32], index: 8, kind: input, shape index: {}]   ;;  %s4212_s9 = inlined_call_operand.vmem [shape: f32[1,32], index: 9, kind: input, shape index: {}]   ;;  %s4213_s10 = inlined_call_operand.vmem [shape: f32[1,32], index: 10, kind: input, shape index: {}]   ;;  %s4214_s11 = inlined_call_operand.vmem [shape: f32[1,32], index: 11, kind: input, shape index: {}]   ;;  %s4215_s12 = inlined_call_operand.vmem [shape: f32[72,32], index: 12, kind: output, shape index: {}]  }
   0x1 LB: > { %s2889_s22 = sadd.s32 4294967295, %s3634_s21   ;;  %p2893_p0 = scmp.ge.s32.totalorder %s3634_s21, 1  ;;  %s3634_s21 = sphi %s3711_s21, %s22_s21  }
   0x2   : > { %p363_p1 = scmp.lt.s32.totalorder %s3634_s21, 4 }
   0x4   : > { %p364_p2 = pnand %p2893_p0, %p363_p1 }
   0x5   : > { %v420_v0 = vld [vmem:[%s4204_s1] sm:$0xff] (!%p364_p2)  ;;  %v421_v1 = vld [vmem:[%s4204_s1 + $0x8] sm:$0xff] (!%p364_p2)  ;;  %v422_v2 = vld [vmem:[%s4204_s1 + $0x10] sm:$0xff] (!%p364_p2)  ;;  %v3636_v3 = vmov (!%p364_p2), 0.0|0.0   ;;  %vm3637_vm0 = vmmov (!%p364_p2), 0   ;;  %v3638_v6 = vmov (!%p364_p2), 0.0  }
   0x6   : > { %367 = sbr.rel (%p364_p2) target bundleno = 5467 (0x155b), region = 68  ;;  %3330 = vmatprep.subr.bf16.mxu0 (!%p364_p2), %v3636_v3  ;;  %v3331_v4 = vpack.c.bf16 (!%p364_p2), %v421_v1, %v420_v0  ;;  %v423_v5 = vld [vmem:[%s4204_s1 + $0x18] sm:$0xff] (!%p364_p2)  ;;  %3100 = vmatprep.mubr.msk.f32.mxu0 (!%p364_p2), %vm3637_vm0, %v3638_v6  ;;  %v517_v8 = vld [vmem:[%s4205_s2] sm:$0xff] (!%p364_p2)  ;;  %v518_v9 = vld [vmem:[%s4205_s2 + $0x8] sm:$0xff] (!%p364_p2)  ;;  %vm424_vm1 = vcmask (!%p364_p2), 261120   ;;  %vm697_vm2 = vcmask (!%p364_p2), 64512  }
   0x7   : > { %s405_s13 = smul.u32 (!%p364_p2), 3, %s2889_s22  ;;  %v3334_v7 = vpack.c.bf16 (!%p364_p2), %v423_v5, %v422_v2  ;;  %v3337_v10 = vpack.c.bf16 (!%p364_p2), %v518_v9, %v517_v8  ;;  %v519_v11 = vld [vmem:[%s4205_s2 + $0x10] sm:$0xff] (!%p364_p2)  ;;  %v520_v12 = vld [vmem:[%s4205_s2 + $0x18] sm:$0xff] (!%p364_p2)  ;;  %v604_v17 = vld [vmem:[%s4206_s3] sm:$0xff] (!%p364_p2)  ;;  %s3639_s19 = smov (!%p364_p2), 120   ;;  %vm817_vm4 = vcmask (!%p364_p2), 1043456  }
   0x8   : > { %3332 = vmatpush3.bf16.msra.mxu0 (!%p364_p2), %v3331_v4  ;;  %v3340_v15 = vpack.c.bf16 (!%p364_p2), %v520_v12, %v519_v11  ;;  %v605_v18 = vld [vmem:[%s4206_s3 + $0x8] sm:$0xff] (!%p364_p2)  ;;  %v606_v19 = vld [vmem:[%s4206_s3 + $0x10] sm:$0xff] (!%p364_p2)  ;;  %v607_v22 = vld [vmem:[%s4206_s3 + $0x18] sm:$0xff] (!%p364_p2)  ;;  %vm3640_vm5 = vmmov (!%p364_p2), 1   ;;  %vm791_vm7 = vcmask (!%p364_p2), 93184   ;;  %vm787_vm8 = vcmask (!%p364_p2), 97280  }
   0x9   : > { %p406_p3 = scmp.lt.s32.totalorder (!%p364_p2), %s405_s13, 8  ;;  %3333 = vmatprep.subr.bf16.mxu0 (!%p364_p2), %v3636_v3  ;;  %v3343_v21 = vpack.c.bf16 (!%p364_p2), %v605_v18, %v604_v17  ;;  %v3346_v24 = vpack.c.bf16 (!%p364_p2), %v607_v22, %v606_v19  ;;  %vm3809_vm3 = vmpackc.low (!%p364_p2), %vm697_vm2, %vm697_vm2  ;;  %s3641_s20 = smov (!%p364_p2), 112   ;;  %vm897_vm9 = vcmask (!%p364_p2), 60416   ;;  %vm1122_vm10 = vcmask (!%p364_p2), 130112   ;;  %v2464_v59 = vld [vmem:[%s4207_s4 + $0x18] sm:$0xff] (!%p364_p2) }
   0xa   : > { %vm3837_vm6 = vmpackc.low (!%p364_p2), %vm817_vm4, %vm3640_vm5  ;;  %s3643_s23 = smov (!%p364_p2), 8   ;;  %s3644_s24 = smov (!%p364_p2), 16   ;;  %vm1349_vm11 = vcmask (!%p364_p2), 195712   ;;  %vm1576_vm12 = vcmask (!%p364_p2), 261312   ;;  %vm1124_vm13 = vcmask (!%p364_p2), 126016   ;;  %vm1351_vm14 = vcmask (!%p364_p2), 191616  }
   0xb   : > { %s3645_s25 = smov (!%p364_p2), 24   ;;  %vm1578_vm15 = vcmask (!%p364_p2), 257216  }
   0xc   : > { %3335 = vmatpush3.bf16.msra.mxu0 (!%p364_p2), %v3334_v7 }
   0xd   : > { %s4221_s13 = smov (!%p406_p3, %s405_s13), 8  ;;  %3336 = vmatprep.subr.bf16.mxu0 %v3636_v3 }
   0xe   : > { %s2894_s18 = sshll.u32 %s4221_s13, 3 }
   0xf   : > { %s409_s22 = scalar_lea.vmem %s4203_s0, %s2894_s18 }
  0x10   : > { %v417_v13 = vld [vmem:[%s409_s22] sm:$0xff]  ;;  %v418_v14 = vld [vmem:[%s409_s22 + $0x8] sm:$0xff]  ;;  %v419_v16 = vld [vmem:[%s409_s22 + $0x10] sm:$0xff]  ;;  %s3642_s22 = smov 104  }
  0x11   : > { %3101 = vmatmul.mubr.msk.f32.vlgmr.msra.gmra.mrb[0].mxu0 %vm424_vm1, %v417_v13 }
  0x12   : > { %3103 = vmatprep.mubr.msk.f32.mxu0 %vm3637_vm0, %v3638_v6  ;;  %3338 = vmatpush3.bf16.msra.mxu0 %v3337_v10 }
  0x13   : > { %3339 = vmatprep.subr.bf16.mxu0 %v3636_v3 }
  0x15   : > { %3104 = vmatmul.mubr.msk.f32.gmra.mrb[2].mxu0 %vm424_vm1, %v418_v14 }
  0x16   : > { %3106 = vmatprep.mubr.msk.f32.mxu0 %vm3637_vm0, %v3638_v6  ;;  %3341 = vmatpush3.bf16.msra.mxu0 %v3340_v15 }
  0x17   : > { %3342 = vmatprep.subr.bf16.mxu0 %v3636_v3 }
  0x19   : > { %3107 = vmatmul.mubr.msk.f32.gmra.mrb[4].mxu0 %vm424_vm1, %v419_v16 }
  0x1a   : > { %3117 = vmatprep.mubr.msk.f32.mxu0 %vm3637_vm0, %v3638_v6 }
  0x1d   : > { %3118 = vmatmul.mubr.msk.f32.vlgmr.msra.gmra.mrb[6].mxu0 %vm424_vm1, %v417_v13 }
  0x1e   : > { %3120 = vmatprep.mubr.msk.f32.mxu0 %vm3637_vm0, %v3638_v6  ;;  %3344 = vmatpush3.bf16.msra.mxu0 %v3343_v21 }
  0x1f   : > { %3345 = vmatprep.subr.bf16.mxu0 %v3636_v3 }
  0x21   : > { %3121 = vmatmul.mubr.msk.f32.gmra.mrb[8].mxu0 %vm424_vm1, %v418_v14 }
  0x22   : > { %3123 = vmatprep.mubr.msk.f32.mxu0 %vm3637_vm0, %v3638_v6  ;;  %3347 = vmatpush3.bf16.msra.mxu0 %v3346_v24 }
  0x25   : > { %3124 = vmatmul.mubr.msk.f32.gmra.mrb[10].mxu0 %vm424_vm1, %v419_v16 }
  0x26   : > { %3134 = vmatprep.mubr.msk.f32.mxu0 %vm3637_vm0, %v3638_v6 }
  0x29   : > { %3135 = vmatmul.mubr.msk.f32.vlgmr.msra.gmra.mrb[12].mxu0 %vm424_vm1, %v417_v13 }
  0x2a   : > { %3137 = vmatprep.mubr.msk.f32.mxu0 %vm3637_vm0, %v3638_v6 }
  0x2d   : > { %3138 = vmatmul.mubr.msk.f32.gmra.mrb[14].mxu0 %vm424_vm1, %v418_v14 }
  0x2e   : > { %3140 = vmatprep.mubr.msk.f32.mxu0 %vm3637_vm0, %v3638_v6 }
  0x31   : > { %3141 = vmatmul.mubr.msk.f32.gmra.mrb[16].mxu0 %vm424_vm1, %v419_v16 }
  0xe4   : > { %v500_v20 = vpop.f32.mrb[0].mxu0 }
  0xe5   : > { %514 = vst.msk [vmem:[#allocation2] sm:$0xff] %vm424_vm1, %v500_v20  ;;  %v3102_v23 = vpop.f32.mrb[1].mxu0 }
  0xe8   : > { %v505_v25 = vpop.f32.mrb[2].mxu0 }
  0xe9   : > { %515 = vst.msk [vmem:[#allocation2 + $0x8] sm:$0xff] %vm424_vm1, %v505_v25  ;;  %v3105_v26 = vpop.f32.mrb[3].mxu0 }
  0xec   : > { %v510_v27 = vpop.f32.mrb[4].mxu0  ;;  %v3791_v28 = vld [vmem:[#allocation2] sm:$0xff] }
  0xed   : > { %516 = vst.msk [vmem:[#allocation2 + $0x10] sm:$0xff] %vm424_vm1, %v510_v27  ;;  %v3108_v29 = vpop.f32.mrb[5].mxu0  ;;  %3147 = vmatprep.mubr.msk.f32.mxu1 %vm697_vm2, %v3791_v28 }
  0xf0   : > { %v587_v30 = vpop.f32.mrb[6].mxu0  ;;  %v900_v31 = vld [vmem:[#allocation2 + $0x8] sm:$0xf] }
  0xf1   : > { %601 = vst.msk [vmem:[#allocation3] sm:$0xff] %vm424_vm1, %v587_v30  ;;  %909 = vrot.lane.b32.xlu1 %v900_v31, %s3639_s19  ;;  %v3119_v32 = vpop.f32.mrb[7].mxu0  ;;  %v692_v43 = vld [vmem:[#allocation2 + $0x8] sm:$0xf] }
  0xf4   : > { %v592_v33 = vpop.f32.mrb[8].mxu0 }
  0xf5   : > { %602 = vst.msk [vmem:[#allocation3 + $0x8] sm:$0xff] %vm424_vm1, %v592_v33  ;;  %v3122_v34 = vpop.f32.mrb[9].mxu0 }
  0xf8   : > { %v597_v35 = vpop.f32.mrb[10].mxu0  ;;  %v3813_v38 = vld [vmem:[#allocation3] sm:$0xff] }
  0xf9   : > { %603 = vst.msk [vmem:[#allocation3 + $0x10] sm:$0xff] %vm424_vm1, %v597_v35  ;;  %v3125_v36 = vpop.f32.mrb[11].mxu0 }
  0xfc   : > { %v902_v39 = vld [vmem:[#allocation3 + $0x8] sm:$0xf]  ;;  %v674_v50 = vpop.f32.mrb[12].mxu0 }
  0xfd   : > { %v694_v40 = vld [vmem:[#allocation3 + $0x8] sm:$0xf]  ;;  %v3498_v41 = vpack.i.bf16 %v902_v39, %v3813_v38  ;;  %688 = vst.msk [vmem:[#allocation4] sm:$0xff] %vm424_vm1, %v674_v50  ;;  %v3136_v51 = vpop.f32.mrb[13].mxu0  ;;  %v1127_v39 = vld [vmem:[#allocation2 + $0x8] sm:$0xf] }
  0xfe   : > { %v3348_v42 = vpack.c.bf16 %v694_v40, %v3813_v38  ;;  %v1129_v31 = vld [vmem:[#allocation3 + $0x8] sm:$0xf] }
  0xff   : > { %3499 = vrot.lane.b32.xlu0 %v3498_v41, %s3639_s19  ;;  %v3508_v32 = vpack.i.bf16 %v1129_v31, %v3813_v38 }
 0x100   : > { %3350 = vmatprep.subr.msk.bf16.mxu1 %vm3809_vm3, %v3348_v42  ;;  %v679_v52 = vpop.f32.mrb[14].mxu0 }
 0x101   : > { %3353 = vmatpush3.bf16.xpose.msk.msra.mxu1 %vm3809_vm3, %v3348_v42  ;;  %689 = vst.msk [vmem:[#allocation4 + $0x8] sm:$0xff] %vm424_vm1, %v679_v52  ;;  %v3139_v53 = vpop.f32.mrb[15].mxu0 }
 0x103   : > { %907 = vrot.lane.b32.xlu0 %v3791_v28, %s3639_s19 }
 0x104   : > { %v684_v54 = vpop.f32.mrb[16].mxu0  ;;  %v3834_v56 = vld [vmem:[#allocation4] sm:$0xff] }
 0x105   : > { %690 = vst.msk [vmem:[#allocation4 + $0x10] sm:$0xff] %vm424_vm1, %v684_v54  ;;  %v3142_v55 = vpop.f32.mrb[17].mxu0 }
 0x108   : > { %3148 = vmatmul.mubr.msk.f32.vlgmr.msra.gmra.mrb[0].mxu1 %vm697_vm2, %v692_v43  ;;  %v696_v57 = vld [vmem:[#allocation4 + $0x8] sm:$0xf] }
 0x109   : > { %v3354_v58 = vpack.c.bf16 %v696_v57, %v3834_v56  ;;  %v904_v33 = vld [vmem:[#allocation4 + $0x8] sm:$0xf] }
 0x10a   : > { %v3503_v34 = vpack.i.bf16 %v904_v33, %v3834_v56 }
 0x10b   : > { %3356 = vmatprep.subr.msk.bf16.mxu1 %vm3837_vm6, %v3354_v58 }
 0x10c   : > { %3359 = vmatpush3.bf16.msk.msra.mxu1 %vm3837_vm6, %v3354_v58 }
 0x163   : > { %v910_v49 = vpop.permute.xlu1 %909 }
 0x171   : > { %v3500_v44 = vpop.permute.xlu0 %3499 }
 0x172   : > { %v3502_v45 = vunpack.i.h.bf16 %v3500_v44  ;;  %v3501_v46 = vunpack.i.l.bf16 %v3500_v44 }
 0x174   : > { %v3360_v47 = vpack.c.bf16 %v3502_v45, %v3501_v46 }
 0x175   : > { %v908_v48 = vpop.permute.xlu0 %907 }
 0x176   : > { %3362 = vmatprep.subr.msk.bf16.mxu0 %vm3809_vm3, %v3360_v47  ;;  %3161 = vmatprep.mubr.msk.f32.mxu0 %vm697_vm2, %v908_v48 }
 0x177   : > { %3365 = vmatpush3.bf16.xpose.msk.msra.mxu0 %vm3809_vm3, %v3360_v47 }
 0x17e   : > { %3162 = vmatmul.mubr.msk.f32.vlgmr.msra.gmra.mrb[18].mxu0 %vm697_vm2, %v910_v49 }
 0x1db   : > { %v3149_v60 = vpop.f32.mrb[0].mxu1 }
 0x1dc   : > { %v786_v61 = vmul.f32 0.35355338, %v3149_v60  ;;  %v776_v62 = vpop.f32.mrb[1].mxu1 }
 0x1dd   : > { %v785_v63 = vmul.f32 0.35355338, %v776_v62 }
 0x1de   : > { %v792_v0 = vsel %vm791_vm7, %v786_v61, -inf }
 0x1df   : > { %793 = vmax.xlane.f32.xlu0 %v792_v0  ;;  %v788_v1 = vsel %vm787_vm8, %v785_v63, -inf }
 0x1e0   : > { %789 = vmax.xlane.f32.xlu1 %v788_v1 }
 0x251   : > { %v3163_v2 = vpop.f32.mrb[18].mxu0 }
 0x252   : > { %v1001_v4 = vmul.f32 0.35355338, %v3163_v2  ;;  %v991_v5 = vpop.f32.mrb[19].mxu0 }
 0x253   : > { %v1000_v7 = vmul.f32 0.35355338, %v991_v5 }
 0x254   : > { %v1005_v8 = vsel %vm791_vm7, %v1001_v4, -inf }
 0x255   : > { %1006 = vmax.xlane.f32.xlu1 %v1005_v8  ;;  %v1002_v9 = vsel %vm787_vm8, %v1000_v7, -inf }
 0x256   : > { %1003 = vmax.xlane.f32.xlu0 %v1002_v9 }
 0x26c   : > { %v794_v10 = vpop.xlane.xlu0 %793 }
 0x26d   : > { %v796_v11 = vsub.f32 %v786_v61, %v794_v10  ;;  %v790_v12 = vpop.xlane.xlu1 %789 }
 0x26e   : > { %v795_v13 = vsub.f32 %v785_v63, %v790_v12 }
 0x26f   : > { %v799_v14 = vmul.f32 1.442695, %v796_v11 }
 0x270   : > { %v797_v15 = vmul.f32 1.442695, %v795_v13 }
 0x271   : > { %3558 = vpow2.f32 %v799_v14 }
 0x272   : > { %3560 = vpow2.f32 %v797_v15 }
 0x27b   : > { %v3559_v16 = vpop.eup %3558 }
 0x27c   : > { %v3561_v17 = vpop.eup %3560  ;;  %v804_v18 = vsel %vm791_vm7, %v3559_v16, 0.0 }
 0x27d   : > { %805 = vadd.xlane.f32.xlu1 %v804_v18  ;;  %v801_v19 = vsel %vm787_vm8, %v3561_v17, 0.0 }
 0x27e   : > { %802 = vadd.xlane.f32.xlu0 %v801_v19 }
 0x2e2   : > { %v1007_v20 = vpop.xlane.xlu1 %1006 }
 0x2e3   : > { %v1009_v21 = vsub.f32 %v1001_v4, %v1007_v20  ;;  %v1004_v22 = vpop.xlane.xlu0 %1003  ;;  %v1356_v20 = vld [vmem:[#allocation3 + $0x8] sm:$0xf] }
 0x2e4   : > { %v1008_v23 = vsub.f32 %v1000_v7, %v1004_v22  ;;  %v1131_v22 = vld [vmem:[#allocation4 + $0x8] sm:$0xf] }
 0x2e5   : > { %v1012_v24 = vmul.f32 1.442695, %v1009_v21  ;;  %v3518_v21 = vpack.i.bf16 %v1356_v20, %v3813_v38 }
 0x2e6   : > { %v1010_v25 = vmul.f32 1.442695, %v1008_v23  ;;  %v3513_v23 = vpack.i.bf16 %v1131_v22, %v3834_v56 }
 0x2e7   : > { %3562 = vpow2.f32 %v1012_v24  ;;  %v1354_v24 = vld [vmem:[#allocation2 + $0x8] sm:$0xf] }
 0x2e8   : > { %3564 = vpow2.f32 %v1010_v25 }
 0x2f1   : > { %v3563_v26 = vpop.eup %3562 }
 0x2f2   : > { %v3565_v27 = vpop.eup %3564  ;;  %v1017_v29 = vsel %vm791_vm7, %v3563_v26, 0.0 }
 0x2f3   : > { %1018 = vadd.xlane.f32.xlu1 %v1017_v29  ;;  %v1014_v30 = vsel %vm787_vm8, %v3565_v27, 0.0 }
 0x2f4   : > { %1015 = vadd.xlane.f32.xlu0 %v1014_v30 }
 0x304   : > { %3509 = vrot.lane.b32.xlu1 %v3508_v32, %s3641_s20 }
 0x308   : > { %1134 = vrot.lane.b32.xlu1 %v3791_v28, %s3641_s20 }
 0x30a   : > { %v806_v35 = vpop.xlane.xlu1 %805  ;;  %3504 = vrot.lane.b32.xlu0 %v3503_v34, %s3639_s19 }
 0x30b   : > { %3566 = vrcp.f32 %v806_v35  ;;  %v803_v36 = vpop.xlane.xlu0 %802 }
 0x30c   : > { %3568 = vrcp.f32 %v803_v36 }
 0x30e   : > { %1136 = vrot.lane.b32.xlu0 %v1127_v39, %s3641_s20 }
 0x315   : > { %v3567_v40 = vpop.eup %3566 }
 0x316   : > { %v3569_v41 = vpop.eup %3568  ;;  %v810_v43 = vmul.f32 %v3567_v40, %v3559_v16 }
 0x317   : > { %v808_v42 = vmul.f32 %v3569_v41, %v3561_v17  ;;  %v3899_v41 = vld [vmem:[#allocation4 + $0xc] sm:$0xff] }
 0x319   : > { %3154 = vmatprep.mubr.msk.f32.mxu1 %vm787_vm8, %v808_v42  ;;  %v1585_v42 = vld [vmem:[#allocation4 + $0x14] sm:$0xf] }
 0x31a   : > { %3155 = vmatmul.mubr.msk.f32.vlgmr.msra.gmra.mrb[2].mxu1 %vm787_vm8, %v810_v43  ;;  %v3402_v43 = vpack.c.bf16 %v1585_v42, %v3899_v41  ;;  %v1786_v42 = vld [vmem:[#allocation3 + $0x14] sm:$0xf] }
 0x380   : > { %v1019_v44 = vpop.xlane.xlu1 %1018 }
 0x381   : > { %3570 = vrcp.f32 %v1019_v44  ;;  %v1016_v45 = vpop.xlane.xlu0 %1015 }
 0x382   : > { %3572 = vrcp.f32 %v1016_v45 }
 0x384   : > { %v3510_v46 = vpop.permute.xlu1 %3509 }
 0x385   : > { %v3505_v47 = vpop.permute.xlu0 %3504  ;;  %v3512_v48 = vunpack.i.h.bf16 %v3510_v46  ;;  %v3511_v49 = vunpack.i.l.bf16 %v3510_v46 }
 0x386   : > { %v3507_v50 = vunpack.i.h.bf16 %v3505_v47  ;;  %v3506_v51 = vunpack.i.l.bf16 %v3505_v47 }
 0x387   : > { %v3372_v53 = vpack.c.bf16 %v3512_v48, %v3511_v49 }
 0x388   : > { %v3366_v52 = vpack.c.bf16 %v3507_v50, %v3506_v51  ;;  %v1135_v60 = vpop.permute.xlu1 %1134 }
 0x389   : > { %v1137_v61 = vpop.permute.xlu0 %1136 }
 0x38a   : > { %3368 = vmatprep.subr.msk.bf16.mxu1 %vm3837_vm6, %v3366_v52 }
 0x38b   : > { %v3571_v54 = vpop.eup %3570  ;;  %3371 = vmatpush3.bf16.msk.msra.mxu1 %vm3837_vm6, %v3366_v52 }
 0x38c   : > { %v3573_v55 = vpop.eup %3572  ;;  %3374 = vmatprep.subr.msk.bf16.mxu1 %vm3809_vm3, %v3372_v53  ;;  %v1023_v58 = vmul.f32 %v3571_v54, %v3563_v26 }
 0x38d   : > { %v1021_v57 = vmul.f32 %v3573_v55, %v3565_v27 }
 0x38f   : > { %3168 = vmatprep.mubr.msk.f32.mxu1 %vm787_vm8, %v1021_v57 }
 0x390   : > { %3169 = vmatmul.mubr.msk.f32.vlgmr.msra.gmra.mrb[4].mxu1 %vm787_vm8, %v1023_v58 }
 0x391   : > { %3175 = vmatprep.mubr.msk.f32.mxu1 %vm697_vm2, %v1135_v60 }
 0x394   : > { %3377 = vmatpush3.bf16.xpose.msk.msra.mxu1 %vm3809_vm3, %v3372_v53 }
 0x39b   : > { %3176 = vmatmul.mubr.msk.f32.vlgmr.msra.gmra.mrb[6].mxu1 %vm697_vm2, %v1137_v61 }
 0x3ed   : > { %v3156_v62 = vpop.f32.mrb[2].mxu1 }
 0x3ee   : > { %898 = vst.msk [vmem:[#allocation5 + $0x8] sm:$0xf] %vm897_vm9, %v3156_v62  ;;  %v887_v63 = vpop.f32.mrb[3].mxu1 }
 0x3ef   : > { %896 = vst.msk [vmem:[#allocation5] sm:$0xff] %vm697_vm2, %v887_v63 }
 0x463   : > { %v3876_v0 = vpop.f32.mrb[4].mxu1 }
 0x464   : > { %v3878_v1 = vpop.f32.mrb[5].mxu1 }
 0x46e   : > { %v3177_v2 = vpop.f32.mrb[6].mxu1 }
 0x46f   : > { %v1228_v4 = vmul.f32 0.35355338, %v3177_v2  ;;  %v1218_v5 = vpop.f32.mrb[7].mxu1 }
 0x470   : > { %v1227_v7 = vmul.f32 0.35355338, %v1218_v5 }
 0x471   : > { %v1232_v8 = vsel %vm791_vm7, %v1228_v4, -inf }
 0x472   : > { %1233 = vmax.xlane.f32.xlu0 %v1232_v8  ;;  %v1229_v9 = vsel %vm787_vm8, %v1227_v7, -inf  ;;  %v1784_v8 = vld [vmem:[#allocation2 + $0x14] sm:$0xf] }
 0x473   : > { %1230 = vmax.xlane.f32.xlu1 %v1229_v9 }
 0x4ff   : > { %v1234_v10 = vpop.xlane.xlu0 %1233 }
 0x500   : > { %v1236_v11 = vsub.f32 %v1228_v4, %v1234_v10  ;;  %v1231_v12 = vpop.xlane.xlu1 %1230  ;;  %v1358_v4 = vld [vmem:[#allocation4 + $0x8] sm:$0xf] }
 0x501   : > { %v1235_v13 = vsub.f32 %v1227_v7, %v1231_v12  ;;  %v3523_v5 = vpack.i.bf16 %v1358_v4, %v3834_v56  ;;  %v3920_v7 = vld [vmem:[#allocation2 + $0xc] sm:$0xff] }
 0x502   : > { %v1239_v14 = vmul.f32 1.442695, %v1236_v11  ;;  %v1583_v56 = vld [vmem:[#allocation3 + $0x14] sm:$0xf] }
 0x503   : > { %v1237_v15 = vmul.f32 1.442695, %v1235_v13 }
 0x504   : > { %3574 = vpow2.f32 %v1239_v14  ;;  %v3925_v14 = vld [vmem:[#allocation3 + $0xc] sm:$0xff] }
 0x505   : > { %3576 = vpow2.f32 %v1237_v15 }
 0x50e   : > { %v3575_v16 = vpop.eup %3574 }
 0x50f   : > { %v3577_v17 = vpop.eup %3576  ;;  %v1244_v18 = vsel %vm791_vm7, %v3575_v16, 0.0 }
 0x510   : > { %1245 = vadd.xlane.f32.xlu1 %v1244_v18  ;;  %v1241_v19 = vsel %vm787_vm8, %v3577_v17, 0.0 }
 0x511   : > { %1242 = vadd.xlane.f32.xlu0 %v1241_v19 }
 0x521   : > { %3519 = vrot.lane.b32.xlu1 %v3518_v21, %s3642_s22  ;;  %v1581_v21 = vld [vmem:[#allocation2 + $0x14] sm:$0xf] }
 0x525   : > { %1361 = vrot.lane.b32.xlu1 %v3791_v28, %s3642_s22 }
 0x527   : > { %3514 = vrot.lane.b32.xlu0 %v3513_v23, %s3641_s20 }
 0x52b   : > { %1363 = vrot.lane.b32.xlu0 %v1354_v24, %s3642_s22 }
 0x59d   : > { %v1246_v25 = vpop.xlane.xlu1 %1245 }
 0x59e   : > { %3578 = vrcp.f32 %v1246_v25  ;;  %v1243_v26 = vpop.xlane.xlu0 %1242 }
 0x59f   : > { %3580 = vrcp.f32 %v1243_v26 }
 0x5a1   : > { %v3520_v27 = vpop.permute.xlu1 %3519 }
 0x5a2   : > { %v3515_v38 = vpop.permute.xlu0 %3514  ;;  %v3522_v29 = vunpack.i.h.bf16 %v3520_v27  ;;  %v3521_v30 = vunpack.i.l.bf16 %v3520_v27 }
 0x5a3   : > { %v3517_v31 = vunpack.i.h.bf16 %v3515_v38  ;;  %v3516_v32 = vunpack.i.l.bf16 %v3515_v38 }
 0x5a4   : > { %v3384_v34 = vpack.c.bf16 %v3522_v29, %v3521_v30 }
 0x5a5   : > { %v3378_v33 = vpack.c.bf16 %v3517_v31, %v3516_v32  ;;  %v1362_v40 = vpop.permute.xlu1 %1361 }
 0x5a6   : > { %v1364_v44 = vpop.permute.xlu0 %1363 }
 0x5a7   : > { %3380 = vmatprep.subr.msk.bf16.mxu0 %vm3837_vm6, %v3378_v33 }
 0x5a8   : > { %v3579_v28 = vpop.eup %3578  ;;  %3383 = vmatpush3.bf16.msk.msra.mxu0 %vm3837_vm6, %v3378_v33 }
 0x5a9   : > { %v3581_v35 = vpop.eup %3580  ;;  %3386 = vmatprep.subr.msk.bf16.mxu0 %vm3809_vm3, %v3384_v34  ;;  %v1250_v39 = vmul.f32 %v3579_v28, %v3575_v16  ;;  %v3396_v16 = vpack.c.bf16 %v1583_v56, %v3925_v14 }
 0x5aa   : > { %v1248_v36 = vmul.f32 %v3581_v35, %v3577_v17 }
 0x5ac   : > { %3182 = vmatprep.mubr.msk.f32.mxu0 %vm787_vm8, %v1248_v36 }
 0x5ad   : > { %3183 = vmatmul.mubr.msk.f32.vlgmr.msra.gmra.mrb[20].mxu0 %vm787_vm8, %v1250_v39 }
 0x5ae   : > { %3189 = vmatprep.mubr.msk.f32.mxu0 %vm697_vm2, %v1362_v40 }
 0x5b1   : > { %3389 = vmatpush3.bf16.xpose.msk.msra.mxu0 %vm3809_vm3, %v3384_v34 }
 0x5b2   : > { %3404 = vmatprep.subr.msk.bf16.mxu0 %vm3837_vm6, %v3402_v43 }
 0x5b8   : > { %3190 = vmatmul.mubr.msk.f32.vlgmr.msra.gmra.mrb[22].mxu0 %vm697_vm2, %v1364_v44 }
 0x5b9   : > { %3407 = vmatpush3.bf16.msk.msra.mxu0 %vm3837_vm6, %v3402_v43  ;;  %v3528_v43 = vpack.i.bf16 %v1786_v42, %v3925_v14 }
 0x680   : > { %v3910_v45 = vpop.f32.mrb[20].mxu0 }
 0x681   : > { %v3912_v46 = vpop.f32.mrb[21].mxu0 }
 0x68b   : > { %v3191_v47 = vpop.f32.mrb[22].mxu0 }
 0x68c   : > { %v1455_v48 = vmul.f32 0.35355338, %v3191_v47  ;;  %v1445_v49 = vpop.f32.mrb[23].mxu0 }
 0x68d   : > { %v1454_v50 = vmul.f32 0.35355338, %v1445_v49 }
 0x68e   : > { %v1459_v51 = vsel %vm791_vm7, %v1455_v48, -inf }
 0x68f   : > { %1460 = vmax.xlane.f32.xlu0 %v1459_v51  ;;  %v1456_v52 = vsel %vm787_vm8, %v1454_v50, -inf }
 0x690   : > { %1457 = vmax.xlane.f32.xlu1 %v1456_v52 }
 0x71c   : > { %v1461_v53 = vpop.xlane.xlu0 %1460 }
 0x71d   : > { %v1463_v54 = vsub.f32 %v1455_v48, %v1461_v53  ;;  %v1458_v55 = vpop.xlane.xlu1 %1457 }
 0x71e   : > { %v1462_v57 = vsub.f32 %v1454_v50, %v1458_v55 }
 0x71f   : > { %v1466_v58 = vmul.f32 1.442695, %v1463_v54 }
 0x720   : > { %v1464_v60 = vmul.f32 1.442695, %v1462_v57 }
 0x721   : > { %3582 = vpow2.f32 %v1466_v58 }
 0x722   : > { %3584 = vpow2.f32 %v1464_v60 }
 0x72b   : > { %v3583_v61 = vpop.eup %3582 }
 0x72c   : > { %v3585_v62 = vpop.eup %3584  ;;  %v1471_v63 = vsel %vm791_vm7, %v3583_v61, 0.0 }
 0x72d   : > { %1472 = vadd.xlane.f32.xlu1 %v1471_v63  ;;  %v1468_v2 = vsel %vm787_vm8, %v3585_v62, 0.0 }
 0x72e   : > { %1469 = vadd.xlane.f32.xlu0 %v1468_v2 }
 0x744   : > { %3524 = vrot.lane.b32.xlu0 %v3523_v5, %s3642_s22 }
 0x748   : > { %1791 = vrot.lane.b32.xlu0 %v3920_v7, %s3639_s19 }
 0x74c   : > { %1793 = vrot.lane.b32.xlu0 %v1784_v8, %s3639_s19 }
 0x7ba   : > { %v1473_v9 = vpop.xlane.xlu1 %1472 }
 0x7bb   : > { %3586 = vrcp.f32 %v1473_v9  ;;  %v1470_v10 = vpop.xlane.xlu0 %1469  ;;  %v2011_v9 = vld [vmem:[#allocation3 + $0x14] sm:$0xf] }
 0x7bc   : > { %3588 = vrcp.f32 %v1470_v10  ;;  %v3538_v10 = vpack.i.bf16 %v2011_v9, %v3925_v14  ;;  %v2013_v9 = vld [vmem:[#allocation4 + $0x14] sm:$0xf] }
 0x7bf   : > { %v3525_v11 = vpop.permute.xlu0 %3524 }
 0x7c0   : > { %v3527_v12 = vunpack.i.h.bf16 %v3525_v11  ;;  %v3526_v13 = vunpack.i.l.bf16 %v3525_v11 }
 0x7c2   : > { %v3390_v15 = vpack.c.bf16 %v3527_v12, %v3526_v13 }
 0x7c3   : > { %v1792_v57 = vpop.permute.xlu0 %1791 }
 0x7c4   : > { %3392 = vmatprep.subr.msk.bf16.mxu1 %vm3837_vm6, %v3390_v15 }
 0x7c5   : > { %v3587_v17 = vpop.eup %3586  ;;  %3395 = vmatpush3.bf16.msk.msra.mxu1 %vm3837_vm6, %v3390_v15 }
 0x7c6   : > { %v3589_v18 = vpop.eup %3588  ;;  %3398 = vmatprep.subr.msk.bf16.mxu1 %vm3809_vm3, %v3396_v16  ;;  %v1477_v20 = vmul.f32 %v3587_v17, %v3583_v61 }
 0x7c7   : > { %v1475_v19 = vmul.f32 %v3589_v18, %v3585_v62  ;;  %v1794_v58 = vpop.permute.xlu0 %1793 }
 0x7c9   : > { %3196 = vmatprep.mubr.msk.f32.mxu1 %vm787_vm8, %v1475_v19 }
 0x7ca   : > { %3197 = vmatmul.mubr.msk.f32.vlgmr.msra.gmra.mrb[8].mxu1 %vm787_vm8, %v1477_v20 }
 0x7cb   : > { %3203 = vmatprep.mubr.msk.f32.mxu1 %vm697_vm2, %v3920_v7 }
 0x7ce   : > { %3401 = vmatpush3.bf16.xpose.msk.msra.mxu1 %vm3809_vm3, %v3396_v16 }
 0x7d5   : > { %3204 = vmatmul.mubr.msk.f32.vlgmr.msra.gmra.mrb[10].mxu1 %vm697_vm2, %v1581_v21  ;;  %v1788_v21 = vld [vmem:[#allocation4 + $0x14] sm:$0xf] }
 0x89d   : > { %v3941_v22 = vpop.f32.mrb[8].mxu1 }
 0x89e   : > { %v3943_v23 = vpop.f32.mrb[9].mxu1 }
 0x8a8   : > { %v3205_v24 = vpop.f32.mrb[10].mxu1 }
 0x8a9   : > { %v1664_v25 = vpop.f32.mrb[11].mxu1  ;;  %v1674_v27 = vmul.f32 0.35355338, %v3205_v24  ;;  %v3533_v24 = vpack.i.bf16 %v1788_v21, %v3899_v41 }
 0x8aa   : > { %v1673_v26 = vmul.f32 0.35355338, %v1664_v25  ;;  %v2009_v25 = vld [vmem:[#allocation2 + $0x14] sm:$0xf] }
 0x8ab   : > { %v1678_v29 = vsel %vm791_vm7, %v1674_v27, -inf }
 0x8ac   : > { %v1675_v38 = vsel %vm787_vm8, %v1673_v26, -inf }
 0x8ad   : > { %1676 = vmax.xlane.f32.xlu1 %v1675_v38 }
 0x8b1   : > { %1679 = vmax.xlane.f32.xlu1 %v1678_v29 }
 0x93a   : > { %v1677_v30 = vpop.xlane.xlu1 %1676 }
 0x93b   : > { %v1681_v31 = vsub.f32 %v1673_v26, %v1677_v30 }
 0x93d   : > { %v1683_v34 = vmul.f32 1.442695, %v1681_v31 }
 0x93e   : > { %v1680_v32 = vpop.xlane.xlu1 %1679 }
 0x93f   : > { %v1682_v33 = vsub.f32 %v1674_v27, %v1680_v32 }
 0x941   : > { %v1685_v28 = vmul.f32 1.442695, %v1682_v33 }
 0x943   : > { %3590 = vpow2.f32 %v1685_v28 }
 0x944   : > { %3592 = vpow2.f32 %v1683_v34 }
 0x94d   : > { %v3591_v35 = vpop.eup %3590 }
 0x94e   : > { %v1690_v36 = vsel %vm791_vm7, %v3591_v35, 0.0  ;;  %v3593_v39 = vpop.eup %3592 }
 0x94f   : > { %1691 = vadd.xlane.f32.xlu1 %v1690_v36  ;;  %v1687_v40 = vsel %vm787_vm8, %v3593_v39, 0.0 }
 0x953   : > { %1688 = vadd.xlane.f32.xlu1 %v1687_v40 }
 0x964   : > { %3529 = vrot.lane.b32.xlu1 %v3528_v43, %s3639_s19 }
 0x9dc   : > { %v1692_v44 = vpop.xlane.xlu1 %1691 }
 0x9dd   : > { %3594 = vrcp.f32 %v1692_v44 }
 0x9e0   : > { %v1689_v47 = vpop.xlane.xlu1 %1688 }
 0x9e1   : > { %3596 = vrcp.f32 %v1689_v47 }
 0x9e4   : > { %v3530_v48 = vpop.permute.xlu1 %3529 }
 0x9e5   : > { %v3532_v49 = vunpack.i.h.bf16 %v3530_v48  ;;  %v3531_v50 = vunpack.i.l.bf16 %v3530_v48 }
 0x9e7   : > { %v3408_v51 = vpack.c.bf16 %v3532_v49, %v3531_v50  ;;  %v3595_v52 = vpop.eup %3594 }
 0x9e8   : > { %v1696_v55 = vmul.f32 %v3595_v52, %v3591_v35 }
 0x9e9   : > { %3410 = vmatprep.subr.msk.bf16.mxu0 %vm3809_vm3, %v3408_v51 }
 0x9eb   : > { %v3597_v53 = vpop.eup %3596 }
 0x9ec   : > { %v1694_v54 = vmul.f32 %v3597_v53, %v3593_v39 }
 0x9ee   : > { %3210 = vmatprep.mubr.msk.f32.mxu0 %vm787_vm8, %v1694_v54 }
 0x9ef   : > { %3211 = vmatmul.mubr.msk.f32.vlgmr.msra.gmra.mrb[24].mxu0 %vm787_vm8, %v1696_v55 }
 0x9f0   : > { %3413 = vmatpush3.bf16.xpose.msk.msra.mxu0 %vm3809_vm3, %v3408_v51  ;;  %3217 = vmatprep.mubr.msk.f32.mxu0 %vm697_vm2, %v1792_v57 }
 0x9f7   : > { %3218 = vmatmul.mubr.msk.f32.vlgmr.msra.gmra.mrb[26].mxu0 %vm697_vm2, %v1794_v58 }
 0xac2   : > { %v3212_v60 = vpop.f32.mrb[24].mxu0 }
 0xac3   : > { %1782 = vst.msk [vmem:[#allocation5 + $0x14] sm:$0xf] %vm897_vm9, %v3212_v60  ;;  %v1772_v61 = vpop.f32.mrb[25].mxu0 }
 0xac4   : > { %1781 = vst.msk [vmem:[#allocation5 + $0xc] sm:$0xff] %vm697_vm2, %v1772_v61 }
 0xaca   : > { %v3219_v62 = vpop.f32.mrb[26].mxu0 }
 0xacb   : > { %v1885_v63 = vmul.f32 0.35355338, %v3219_v62  ;;  %v1875_v2 = vpop.f32.mrb[27].mxu0 }
 0xacc   : > { %v1884_v4 = vmul.f32 0.35355338, %v1875_v2 }
 0xacd   : > { %v1889_v5 = vsel %vm791_vm7, %v1885_v63, -inf }
 0xace   : > { %1890 = vmax.xlane.f32.xlu1 %v1889_v5  ;;  %v1886_v8 = vsel %vm787_vm8, %v1884_v4, -inf  ;;  %v2236_v5 = vld [vmem:[#allocation3 + $0x14] sm:$0xf] }
 0xacf   : > { %1887 = vmax.xlane.f32.xlu0 %v1886_v8  ;;  %v3548_v8 = vpack.i.bf16 %v2236_v5, %v3925_v14 }
 0xadf   : > { %3539 = vrot.lane.b32.xlu1 %v3538_v10, %s3641_s20  ;;  %v3543_v10 = vpack.i.bf16 %v2013_v9, %v3899_v41 }
 0xae3   : > { %2016 = vrot.lane.b32.xlu1 %v3920_v7, %s3641_s20 }
 0xb5b   : > { %v1891_v11 = vpop.xlane.xlu1 %1890 }
 0xb5c   : > { %v1893_v12 = vsub.f32 %v1885_v63, %v1891_v11  ;;  %v1888_v13 = vpop.xlane.xlu0 %1887  ;;  %v2234_v11 = vld [vmem:[#allocation2 + $0x14] sm:$0xf] }
 0xb5d   : > { %v1892_v56 = vsub.f32 %v1884_v4, %v1888_v13 }
 0xb5e   : > { %v1896_v15 = vmul.f32 1.442695, %v1893_v12 }
 0xb5f   : > { %v1894_v16 = vmul.f32 1.442695, %v1892_v56  ;;  %v3540_v38 = vpop.permute.xlu1 %3539 }
 0xb60   : > { %3598 = vpow2.f32 %v1896_v15  ;;  %v3542_v30 = vunpack.i.h.bf16 %v3540_v38  ;;  %v3541_v31 = vunpack.i.l.bf16 %v3540_v38 }
 0xb61   : > { %3600 = vpow2.f32 %v1894_v16 }
 0xb62   : > { %v3420_v28 = vpack.c.bf16 %v3542_v30, %v3541_v31 }
 0xb63   : > { %v2017_v42 = vpop.permute.xlu1 %2016 }
 0xb6a   : > { %v3599_v17 = vpop.eup %3598 }
 0xb6b   : > { %v1901_v18 = vsel %vm791_vm7, %v3599_v17, 0.0  ;;  %v3601_v19 = vpop.eup %3600 }
 0xb6c   : > { %1902 = vadd.xlane.f32.xlu0 %v1901_v18  ;;  %v1898_v20 = vsel %vm787_vm8, %v3601_v19, 0.0 }
 0xb70   : > { %1899 = vadd.xlane.f32.xlu0 %v1898_v20 }
 0xb86   : > { %3534 = vrot.lane.b32.xlu0 %v3533_v24, %s3639_s19 }
 0xb8a   : > { %2018 = vrot.lane.b32.xlu0 %v2009_v25, %s3641_s20 }
 0xbf9   : > { %v1903_v26 = vpop.xlane.xlu0 %1902 }
 0xbfa   : > { %3602 = vrcp.f32 %v1903_v26 }
 0xbfd   : > { %v1900_v27 = vpop.xlane.xlu0 %1899 }
 0xbfe   : > { %3604 = vrcp.f32 %v1900_v27 }
 0xc01   : > { %v3535_v29 = vpop.permute.xlu0 %3534 }
 0xc02   : > { %v3537_v32 = vunpack.i.h.bf16 %v3535_v29  ;;  %v3536_v33 = vunpack.i.l.bf16 %v3535_v29 }
 0xc04   : > { %v3414_v34 = vpack.c.bf16 %v3537_v32, %v3536_v33  ;;  %v3603_v35 = vpop.eup %3602 }
 0xc05   : > { %v1907_v40 = vmul.f32 %v3603_v35, %v3599_v17  ;;  %v2019_v43 = vpop.permute.xlu0 %2018 }
 0xc06   : > { %3416 = vmatprep.subr.msk.bf16.mxu1 %vm3837_vm6, %v3414_v34 }
 0xc07   : > { %3419 = vmatpush3.bf16.msk.msra.mxu1 %vm3837_vm6, %v3414_v34 }
 0xc08   : > { %v3605_v36 = vpop.eup %3604  ;;  %3422 = vmatprep.subr.msk.bf16.mxu1 %vm3809_vm3, %v3420_v28 }
 0xc09   : > { %v1905_v39 = vmul.f32 %v3605_v36, %v3601_v19 }
 0xc0b   : > { %3224 = vmatprep.mubr.msk.f32.mxu1 %vm787_vm8, %v1905_v39 }
 0xc0c   : > { %3225 = vmatmul.mubr.msk.f32.vlgmr.msra.gmra.mrb[12].mxu1 %vm787_vm8, %v1907_v40 }
 0xc0d   : > { %3231 = vmatprep.mubr.msk.f32.mxu1 %vm697_vm2, %v2017_v42 }
 0xc10   : > { %3425 = vmatpush3.bf16.xpose.msk.msra.mxu1 %vm3809_vm3, %v3420_v28 }
 0xc17   : > { %3232 = vmatmul.mubr.msk.f32.vlgmr.msra.gmra.mrb[14].mxu1 %vm697_vm2, %v2019_v43 }
 0xcdf   : > { %v3984_v44 = vpop.f32.mrb[12].mxu1 }
 0xce0   : > { %v3986_v47 = vpop.f32.mrb[13].mxu1 }
 0xcea   : > { %v3233_v48 = vpop.f32.mrb[14].mxu1 }
 0xceb   : > { %v2110_v49 = vmul.f32 0.35355338, %v3233_v48  ;;  %v2100_v50 = vpop.f32.mrb[15].mxu1 }
 0xcec   : > { %v2109_v51 = vmul.f32 0.35355338, %v2100_v50 }
 0xced   : > { %v2114_v52 = vsel %vm791_vm7, %v2110_v49, -inf }
 0xcee   : > { %2115 = vmax.xlane.f32.xlu0 %v2114_v52  ;;  %v2111_v53 = vsel %vm787_vm8, %v2109_v51, -inf }
 0xcef   : > { %2112 = vmax.xlane.f32.xlu1 %v2111_v53 }
 0xd7b   : > { %v2116_v54 = vpop.xlane.xlu0 %2115 }
 0xd7c   : > { %v2118_v55 = vsub.f32 %v2110_v49, %v2116_v54  ;;  %v2113_v57 = vpop.xlane.xlu1 %2112  ;;  %v2462_v54 = vld [vmem:[%s4207_s4 + $0x8] sm:$0xff] }
 0xd7d   : > { %v2117_v58 = vsub.f32 %v2109_v51, %v2113_v57  ;;  %v2238_v51 = vld [vmem:[#allocation4 + $0x14] sm:$0xf] }
 0xd7e   : > { %v2121_v60 = vmul.f32 1.442695, %v2118_v55  ;;  %v3553_v52 = vpack.i.bf16 %v2238_v51, %v3899_v41  ;;  %v2679_v51 = vld [vmem:[%s4211_s8 + $0x78] sm:$0xff] }
 0xd7f   : > { %v2119_v61 = vmul.f32 1.442695, %v2117_v58 }
 0xd80   : > { %3606 = vpow2.f32 %v2121_v60 }
 0xd81   : > { %3608 = vpow2.f32 %v2119_v61 }
 0xd8a   : > { %v3607_v62 = vpop.eup %3606 }
 0xd8b   : > { %v3609_v63 = vpop.eup %3608  ;;  %v2126_v2 = vsel %vm791_vm7, %v3607_v62, 0.0 }
 0xd8c   : > { %2127 = vadd.xlane.f32.xlu1 %v2126_v2  ;;  %v2123_v4 = vsel %vm787_vm8, %v3609_v63, 0.0  ;;  %v2463_v2 = vld [vmem:[%s4207_s4 + $0x10] sm:$0xff] }
 0xd8d   : > { %2124 = vadd.xlane.f32.xlu0 %v2123_v4 }
 0xd9d   : > { %3549 = vrot.lane.b32.xlu1 %v3548_v8, %s3642_s22  ;;  %v3448_v8 = vpack.c.bf16 %v2464_v59, %v2463_v2 }
 0xda1   : > { %2241 = vrot.lane.b32.xlu1 %v3920_v7, %s3642_s22 }
 0xda3   : > { %3544 = vrot.lane.b32.xlu0 %v3543_v10, %s3641_s20 }
 0xda7   : > { %2243 = vrot.lane.b32.xlu0 %v2234_v11, %s3642_s22 }
 0xe19   : > { %v2128_v12 = vpop.xlane.xlu1 %2127 }
 0xe1a   : > { %3610 = vrcp.f32 %v2128_v12  ;;  %v2125_v13 = vpop.xlane.xlu0 %2124  ;;  %v2561_v12 = vld [vmem:[%s4209_s6] sm:$0xff] }
 0xe1b   : > { %3612 = vrcp.f32 %v2125_v13  ;;  %v2562_v13 = vld [vmem:[%s4209_s6 + $0x8] sm:$0xff] }
 0xe1d   : > { %v3550_v56 = vpop.permute.xlu1 %3549 }
 0xe1e   : > { %v3545_v15 = vpop.permute.xlu0 %3544  ;;  %v3552_v14 = vunpack.i.h.bf16 %v3550_v56  ;;  %v3551_v16 = vunpack.i.l.bf16 %v3550_v56  ;;  %v3451_v56 = vpack.c.bf16 %v2562_v13, %v2561_v12 }
 0xe1f   : > { %v3547_v17 = vunpack.i.h.bf16 %v3545_v15  ;;  %v3546_v18 = vunpack.i.l.bf16 %v3545_v15  ;;  %v2563_v15 = vld [vmem:[%s4209_s6 + $0x10] sm:$0xff] }
 0xe20   : > { %v3432_v20 = vpack.c.bf16 %v3552_v14, %v3551_v16  ;;  %v2564_v14 = vld [vmem:[%s4209_s6 + $0x18] sm:$0xff] }
 0xe21   : > { %v3426_v19 = vpack.c.bf16 %v3547_v17, %v3546_v18  ;;  %v2242_v26 = vpop.permute.xlu1 %2241  ;;  %v3454_v16 = vpack.c.bf16 %v2564_v14, %v2563_v15 }
 0xe22   : > { %v2244_v27 = vpop.permute.xlu0 %2243 }
 0xe23   : > { %3428 = vmatprep.subr.msk.bf16.mxu0 %vm3837_vm6, %v3426_v19 }
 0xe24   : > { %v3611_v7 = vpop.eup %3610  ;;  %3431 = vmatpush3.bf16.msk.msra.mxu0 %vm3837_vm6, %v3426_v19  ;;  %v2664_v19 = vld [vmem:[%s4211_s8] sm:$0xff] }
 0xe25   : > { %v3613_v21 = vpop.eup %3612  ;;  %3434 = vmatprep.subr.msk.bf16.mxu0 %vm3809_vm3, %v3432_v20  ;;  %v2132_v25 = vmul.f32 %v3611_v7, %v3607_v62  ;;  %v2666_v7 = vld [vmem:[%s4211_s8 + $0x10] sm:$0xff] }
 0xe26   : > { %v2130_v24 = vmul.f32 %v3613_v21, %v3609_v63 }
 0xe28   : > { %3238 = vmatprep.mubr.msk.f32.mxu0 %vm787_vm8, %v2130_v24  ;;  %v2667_v24 = vld [vmem:[%s4211_s8 + $0x18] sm:$0xff] }
 0xe29   : > { %3239 = vmatmul.mubr.msk.f32.vlgmr.msra.gmra.mrb[28].mxu0 %vm787_vm8, %v2132_v25  ;;  %v3460_v25 = vpack.c.bf16 %v2667_v24, %v2666_v7 }
 0xe2a   : > { %3245 = vmatprep.mubr.msk.f32.mxu0 %vm697_vm2, %v2242_v26  ;;  %v4102_v26 = vld [vmem:[%s4208_s5] ss:$0 sm:$0xff] }
 0xe2d   : > { %3437 = vmatpush3.bf16.xpose.msk.msra.mxu0 %vm3809_vm3, %v3432_v20  ;;  %v2665_v20 = vld [vmem:[%s4211_s8 + $0x8] sm:$0xff] }
 0xe2e   : > { %3450 = vmatprep.subr.bf16.mxu0 %v3636_v3  ;;  %v3457_v21 = vpack.c.bf16 %v2665_v20, %v2664_v19 }
 0xe34   : > { %3246 = vmatmul.mubr.msk.f32.vlgmr.msra.gmra.mrb[30].mxu0 %vm697_vm2, %v2244_v27  ;;  %v2668_v27 = vld [vmem:[%s4211_s8 + $0x20] sm:$0xff] }
 0xe35   : > { %3280 = vmatprep.mubr.msk.f32.mxu0 %vm3637_vm0, %v3638_v6  ;;  %3452 = vmatpush3.bf16.msra.mxu0 %v3451_v56 }
 0xe36   : > { %3453 = vmatprep.subr.bf16.mxu0 %v3636_v3 }
 0xe39   : > { %3455 = vmatpush3.bf16.msra.mxu0 %v3454_v16 }
 0xefc   : > { %v4014_v38 = vpop.f32.mrb[28].mxu0 }
 0xefd   : > { %v2214_v29 = vpop.f32.mrb[29].mxu0 }
 0xf07   : > { %v3247_v30 = vpop.f32.mrb[30].mxu0 }
 0xf08   : > { %v2335_v31 = vmul.f32 0.35355338, %v3247_v30  ;;  %v2325_v32 = vpop.f32.mrb[31].mxu0 }
 0xf09   : > { %v2334_v33 = vmul.f32 0.35355338, %v2325_v32 }
 0xf0a   : > { %v2339_v34 = vsel %vm791_vm7, %v2335_v31, -inf }
 0xf0b   : > { %2340 = vmax.xlane.f32.xlu0 %v2339_v34  ;;  %v2336_v37 = vsel %vm787_vm8, %v2334_v33, -inf  ;;  %v2671_v34 = vld [vmem:[%s4211_s8 + $0x38] sm:$0xff] }
 0xf0c   : > { %2337 = vmax.xlane.f32.xlu1 %v2336_v37 }
 0xf98   : > { %v2341_v28 = vpop.xlane.xlu0 %2340 }
 0xf99   : > { %v2343_v35 = vsub.f32 %v2335_v31, %v2341_v28  ;;  %v2338_v36 = vpop.xlane.xlu1 %2337  ;;  %v2672_v28 = vld [vmem:[%s4211_s8 + $0x40] sm:$0xff] }
 0xf9a   : > { %v2342_v39 = vsub.f32 %v2334_v33, %v2338_v36  ;;  %v2670_v33 = vld [vmem:[%s4211_s8 + $0x30] sm:$0xff] }
 0xf9b   : > { %v2346_v40 = vmul.f32 1.442695, %v2343_v35  ;;  %v3466_v37 = vpack.c.bf16 %v2671_v34, %v2670_v33  ;;  %v2673_v35 = vld [vmem:[%s4211_s8 + $0x48] sm:$0xff] }
 0xf9c   : > { %v2344_v42 = vmul.f32 1.442695, %v2342_v39  ;;  %v3469_v36 = vpack.c.bf16 %v2673_v35, %v2672_v28  ;;  %v2674_v39 = vld [vmem:[%s4211_s8 + $0x50] sm:$0xff] }
 0xf9d   : > { %3614 = vpow2.f32 %v2346_v40  ;;  %v2675_v40 = vld [vmem:[%s4211_s8 + $0x58] sm:$0xff] }
 0xf9e   : > { %3616 = vpow2.f32 %v2344_v42  ;;  %v3472_v42 = vpack.c.bf16 %v2675_v40, %v2674_v39 }
 0xfa7   : > { %v3615_v43 = vpop.eup %3614 }
 0xfa8   : > { %v3617_v48 = vpop.eup %3616  ;;  %v2351_v49 = vsel %vm791_vm7, %v3615_v43, 0.0 }
 0xfa9   : > { %2352 = vadd.xlane.f32.xlu1 %v2351_v49  ;;  %v2348_v50 = vsel %vm787_vm8, %v3617_v48, 0.0 }
 0xfaa   : > { %2349 = vadd.xlane.f32.xlu0 %v2348_v50  ;;  %v2678_v50 = vld [vmem:[%s4211_s8 + $0x70] sm:$0xff] }
 0xfba   : > { %1116 = vrot.lane.b32.xlu1 %v3878_v1, %s3643_s23 }
 0xfbe   : > { %1343 = vrot.lane.b32.xlu1 %v3912_v46, %s3644_s24 }
 0xfc0   : > { %3554 = vrot.lane.b32.xlu0 %v3553_v52, %s3642_s22  ;;  %v3478_v52 = vpack.c.bf16 %v2679_v51, %v2678_v50  ;;  %v2971_v50 = vld [vmem:[%s4214_s11] ss:$0 sm:$0xff] }
 0xfc2   : > { %1118 = vrot.lane.b32.xlu1 %v3876_v0, %s3643_s23 }
 0xfc4   : > { %1570 = vrot.lane.b32.xlu0 %v3943_v23, %s3645_s25 }
 0xfc6   : > { %1345 = vrot.lane.b32.xlu1 %v3910_v45, %s3644_s24 }
 0xfc8   : > { %2000 = vrot.lane.b32.xlu0 %v3986_v47, %s3643_s23 }
 0xfca   : > { %1572 = vrot.lane.b32.xlu1 %v3941_v22, %s3645_s25 }
 0xfcc   : > { %2225 = vrot.lane.b32.xlu0 %v2214_v29, %s3644_s24  ;;  %v2669_v29 = vld [vmem:[%s4211_s8 + $0x28] sm:$0xff] }
 0xfcd   : > { %v3463_v32 = vpack.c.bf16 %v2669_v29, %v2668_v27 }
 0xfce   : > { %2002 = vrot.lane.b32.xlu1 %v3984_v44, %s3643_s23  ;;  %v2461_v44 = vld [vmem:[%s4207_s4] sm:$0xff] }
 0xfcf   : > { %v3445_v62 = vpack.c.bf16 %v2462_v54, %v2461_v44 }
0x1036   : > { %v2353_v1 = vpop.xlane.xlu1 %2352 }
0x1037   : > { %3618 = vrcp.f32 %v2353_v1  ;;  %v2350_v41 = vpop.xlane.xlu0 %2349 }
0x1038   : > { %3620 = vrcp.f32 %v2350_v41 }
0x103a   : > { %v1117_v0 = vpop.permute.xlu1 %1116 }
0x103b   : > { %1123 = vst.msk [vmem:[#allocation5] sm:$0xff] %vm1122_vm10, %v1117_v0  ;;  %v3555_v46 = vpop.permute.xlu0 %3554 }
0x103c   : > { %v3557_v23 = vunpack.i.h.bf16 %v3555_v46  ;;  %v3556_v45 = vunpack.i.l.bf16 %v3555_v46 }
0x103e   : > { %v3438_v47 = vpack.c.bf16 %v3557_v23, %v3556_v45  ;;  %v1344_v53 = vpop.permute.xlu1 %1343  ;;  %v2965_v23 = vld [vmem:[%s4210_s7] ss:$0 sm:$0xff] }
0x103f   : > { %1350 = vst.msk [vmem:[#allocation5] sm:$0xff] %vm1349_vm11, %v1344_v53  ;;  %v1571_v22 = vpop.permute.xlu0 %1570 }
0x1040   : > { %1577 = vst.msk [vmem:[#allocation5] sm:$0xff] %vm1576_vm12, %v1571_v22  ;;  %3440 = vmatprep.subr.msk.bf16.mxu1 %vm3837_vm6, %v3438_v47 }
0x1041   : > { %v3619_v55 = vpop.eup %3618  ;;  %3443 = vmatpush3.bf16.msk.msra.mxu1 %vm3837_vm6, %v3438_v47 }
0x1042   : > { %v3621_v57 = vpop.eup %3620  ;;  %v1119_v58 = vpop.permute.xlu1 %1118  ;;  %3444 = vmatprep.subr.bf16.mxu1 %v3636_v3  ;;  %v2357_v63 = vmul.f32 %v3619_v55, %v3615_v43  ;;  %v2676_v43 = vld [vmem:[%s4211_s8 + $0x60] sm:$0xff] }
0x1043   : > { %1125 = vst.msk [vmem:[#allocation5 + $0x8] sm:$0xf] %vm1124_vm13, %v1119_v58  ;;  %v2001_v60 = vpop.permute.xlu0 %2000  ;;  %v2355_v61 = vmul.f32 %v3621_v57, %v3617_v48  ;;  %v2677_v48 = vld [vmem:[%s4211_s8 + $0x68] sm:$0xff] }
0x1044   : > { %2006 = vst.msk [vmem:[#allocation5 + $0xc] sm:$0xff] %vm1122_vm10, %v2001_v60  ;;  %v3475_v49 = vpack.c.bf16 %v2677_v48, %v2676_v43  ;;  %v2970_v48 = vld [vmem:[%s4213_s10] ss:$0 sm:$0xff] }
0x1045   : > { %3252 = vmatprep.mubr.msk.f32.mxu1 %vm787_vm8, %v2355_v61  ;;  %v2969_v61 = vld [vmem:[%s4212_s9] ss:$0 sm:$0xff] }
0x1046   : > { %3253 = vmatmul.mubr.msk.f32.vlgmr.msra.gmra.mrb[16].mxu1 %vm787_vm8, %v2357_v63  ;;  %v1346_v4 = vpop.permute.xlu1 %1345 }
0x1047   : > { %3446 = vmatpush3.bf16.msra.mxu1 %v3445_v62  ;;  %1352 = vst.msk [vmem:[#allocation5 + $0x8] sm:$0xf] %vm1351_vm14, %v1346_v4  ;;  %v2226_v5 = vpop.permute.xlu0 %2225  ;;  %3263 = vmatprep.mubr.msk.f32.mxu1 %vm3637_vm0, %v3638_v6  ;;  %v2458_v10 = vld [vmem:[#allocation5] sm:$0xff] }
0x1048   : > { %2231 = vst.msk [vmem:[#allocation5 + $0xc] sm:$0xff] %vm1349_vm11, %v2226_v5  ;;  %3447 = vmatprep.subr.bf16.mxu1 %v3636_v3 }
0x104a   : > { %v1573_v9 = vpop.permute.xlu1 %1572 }
0x104b   : > { %3449 = vmatpush3.bf16.msra.mxu1 %v3448_v8  ;;  %1579 = vst.msk [vmem:[#allocation5 + $0x8] sm:$0xf] %vm1578_vm15, %v1573_v9 }
0x104c   : > { %3456 = vmatprep.subr.bf16.mxu1 %v3636_v3 }
0x104e   : > { %3264 = vmatmul.mubr.msk.f32.vlgmr.msra.gmra.mrb[18].mxu1 %vm424_vm1, %v2458_v10  ;;  %v2003_v11 = vpop.permute.xlu1 %2002 }
0x104f   : > { %2007 = vst.msk [vmem:[#allocation5 + $0x14] sm:$0xf] %vm1124_vm13, %v2003_v11  ;;  %3266 = vmatprep.mubr.msk.f32.mxu1 %vm3637_vm0, %v3638_v6  ;;  %3458 = vmatpush3.bf16.msra.mxu1 %v3457_v21 }
0x1050   : > { %3459 = vmatprep.subr.bf16.mxu1 %v3636_v3 }
0x1053   : > { %3461 = vmatpush3.bf16.msra.mxu1 %v3460_v25 }
0x1054   : > { %3462 = vmatprep.subr.bf16.mxu1 %v3636_v3 }
0x1057   : > { %3464 = vmatpush3.bf16.msra.mxu1 %v3463_v32 }
0x1058   : > { %3465 = vmatprep.subr.bf16.mxu1 %v3636_v3 }
0x105b   : > { %3467 = vmatpush3.bf16.msra.mxu1 %v3466_v37 }
0x105c   : > { %3468 = vmatprep.subr.bf16.mxu1 %v3636_v3 }
0x105f   : > { %3470 = vmatpush3.bf16.msra.mxu1 %v3469_v36 }
0x1060   : > { %3471 = vmatprep.subr.bf16.mxu1 %v3636_v3 }
0x1063   : > { %3473 = vmatpush3.bf16.msra.mxu1 %v3472_v42 }
0x1064   : > { %3474 = vmatprep.subr.bf16.mxu1 %v3636_v3 }
0x1067   : > { %3476 = vmatpush3.bf16.msra.mxu1 %v3475_v49 }
0x1068   : > { %3477 = vmatprep.subr.bf16.mxu1 %v3636_v3 }
0x106b   : > { %3479 = vmatpush3.bf16.msra.mxu1 %v3478_v52 }
0x1119   : > { %v3254_v17 = vpop.f32.mrb[16].mxu1 }
0x111a   : > { %2452 = vrot.lane.b32.xlu1 %v3254_v17, %s3645_s25  ;;  %v2439_v18 = vpop.f32.mrb[17].mxu1 }
0x111b   : > { %2450 = vrot.lane.b32.xlu0 %v2439_v18, %s3645_s25 }
0x111f   : > { %2227 = vrot.lane.b32.xlu0 %v4014_v38, %s3644_s24  ;;  %s415_s24 = scalar_lea.vmem %s4215_s12, %s2894_s18 }
0x1121   : > { %v2547_v30 = vpop.f32.mrb[18].mxu1 }
0x1122   : > { %v4112_v31 = vadd.f32 %v4102_v26, %v2547_v30  ;;  %v3265_v38 = vpop.f32.mrb[19].mxu1 }
0x1124   : > { %3281 = vmatmul.mubr.msk.f32.vlgmr.msra.gmra.mrb[32].mxu0 %vm424_vm1, %v4112_v31 }
0x1125   : > { %3283 = vmatprep.mubr.msk.f32.mxu0 %vm3637_vm0, %v3638_v6 }
0x118c   : > { %v2453_v0 = vpop.permute.xlu1 %2452 }
0x118d   : > { %v2451_v1 = vpop.permute.xlu0 %2450 }
0x118e   : > { %2456 = vst.msk [vmem:[#allocation5 + $0xc] sm:$0xff] %vm1576_vm12, %v2451_v1 }
0x1191   : > { %v2228_v41 = vpop.permute.xlu0 %2227 }
0x1192   : > { %2232 = vst.msk [vmem:[#allocation5 + $0x14] sm:$0xf] %vm1351_vm14, %v2228_v41 }
0x1193   : > { %2457 = vst.msk [vmem:[#allocation5 + $0x14] sm:$0xf] %vm1578_vm15, %v2453_v0 }
0x1195   : > { %v2459_v3 = vld [vmem:[#allocation5 + $0x8] sm:$0xff] }
0x1196   : > { %3267 = vmatmul.mubr.msk.f32.gmra.mrb[20].mxu1 %vm424_vm1, %v2459_v3 }
0x1197   : > { %3269 = vmatprep.mubr.msk.f32.mxu1 %vm3637_vm0, %v3638_v6 }
0x119a   : > { %v2460_v46 = vld [vmem:[#allocation5 + $0x10] sm:$0xff] }
0x119b   : > { %3270 = vmatmul.mubr.msk.f32.gmra.mrb[22].mxu1 %vm424_vm1, %v2460_v46 }
0x119c   : > { %3321 = vmatprep.mubr.msk.f32.mxu1 %vm3637_vm0, %v3638_v6 }
0x11f7   : > { %v2647_v45 = vpop.f32.mrb[32].mxu0 }
0x11f8   : > { %v2648_v47 = vadd.f32 %v2965_v23, %v2647_v45  ;;  %v3282_v53 = vpop.f32.mrb[33].mxu0 }
0x11fa   : > { %v2661_v22 = vmax.f32 %v2648_v47, 0.0 }
0x11fc   : > { %3322 = vmatmul.mubr.f32.vlgmr.msra.gmra.mrb[24].mxu1 %v2661_v22 }
0x11fd   : > { %3324 = vmatprep.mubr.msk.f32.mxu1 %vm3637_vm0, %v3638_v6 }
0x1269   : > { %v2552_v44 = vpop.f32.mrb[20].mxu1 }
0x126a   : > { %v2553_v54 = vadd.f32 %v4102_v26, %v2552_v44  ;;  %v3268_v55 = vpop.f32.mrb[21].mxu1 }
0x126c   : > { %3284 = vmatmul.mubr.msk.f32.gmra.mrb[34].mxu0 %vm424_vm1, %v2553_v54 }
0x126d   : > { %3286 = vmatprep.mubr.msk.f32.mxu0 %vm3637_vm0, %v3638_v6 }
0x126e   : > { %v2557_v57 = vpop.f32.mrb[22].mxu1 }
0x126f   : > { %v2558_v58 = vadd.f32 %v4102_v26, %v2557_v57  ;;  %v3271_v60 = vpop.f32.mrb[23].mxu1 }
0x1271   : > { %3287 = vmatmul.mubr.msk.f32.gmra.mrb[36].mxu0 %vm424_vm1, %v2558_v58 }
0x12cf   : > { %v2753_v62 = vpop.f32.mrb[24].mxu1 }
0x12d0   : > { %v2754_v63 = vadd.f32 %v2969_v61, %v2753_v62  ;;  %v3323_v2 = vpop.f32.mrb[25].mxu1 }
0x12d2   : > { %v2767_v59 = vadd.f32 %v2754_v63, %v4112_v31 }
0x12d4   : > { %v2770_v4 = vsel %vm424_vm1, %v2767_v59, 0.0 }
0x12d5   : > { %2771 = vadd.xlane.f32.xlu0 %v2770_v4 }
0x133f   : > { %v2652_v5 = vpop.f32.mrb[34].mxu0 }
0x1340   : > { %v2653_v8 = vadd.f32 %v2965_v23, %v2652_v5  ;;  %v3285_v9 = vpop.f32.mrb[35].mxu0 }
0x1342   : > { %v2662_v10 = vmax.f32 %v2653_v8, 0.0 }
0x1344   : > { %v2657_v11 = vpop.f32.mrb[36].mxu0  ;;  %3325 = vmatmul.mubr.f32.gmra.mrb[26].mxu1 %v2662_v10 }
0x1345   : > { %v2658_v12 = vadd.f32 %v2965_v23, %v2657_v11  ;;  %v3288_v13 = vpop.f32.mrb[37].mxu0  ;;  %3327 = vmatprep.mubr.msk.f32.mxu1 %vm3637_vm0, %v3638_v6 }
0x1347   : > { %v2663_v56 = vmax.f32 %v2658_v12, 0.0 }
0x1349   : > { %3328 = vmatmul.mubr.f32.gmra.mrb[28].mxu1 %v2663_v56 }
0x1362   : > { %v2772_v15 = vpop.xlane.xlu0 %2771 }
0x1363   : > { %v2780_v18 = vmul.f32 0.03125, %v2772_v15 }
0x1365   : > { %v2783_v21 = vsub.f32 %v2767_v59, %v2780_v18 }
0x1367   : > { %v2786_v29 = vmul.f32 %v2783_v21, %v2783_v21 }
0x1369   : > { %v2789_v6 = vsel %vm424_vm1, %v2786_v29, 0.0 }
0x1417   : > { %v2758_v14 = vpop.f32.mrb[26].mxu1 }
0x1418   : > { %v2759_v16 = vadd.f32 %v2969_v61, %v2758_v14  ;;  %v3326_v17 = vpop.f32.mrb[27].mxu1 }
0x141a   : > { %v2768_v19 = vadd.f32 %v2759_v16, %v2553_v54 }
0x141c   : > { %v2763_v20 = vpop.f32.mrb[28].mxu1  ;;  %v2773_v7 = vsel %vm424_vm1, %v2768_v19, 0.0 }
0x141d   : > { %v2764_v24 = vadd.f32 %v2969_v61, %v2763_v20  ;;  %2774 = vadd.xlane.f32.xlu1 %v2773_v7  ;;  %v3329_v25 = vpop.f32.mrb[29].mxu1 }
0x141f   : > { %v2769_v26 = vadd.f32 %v2764_v24, %v2558_v58 }
0x1421   : > { %v2776_v27 = vsel %vm424_vm1, %v2769_v26, 0.0 }
0x1422   : > { %2777 = vadd.xlane.f32.xlu0 %v2776_v27 }
0x1426   : > { %2790 = vadd.xlane.f32.xlu0 %v2789_v6 }
0x14aa   : > { %v2775_v30 = vpop.xlane.xlu1 %2774 }
0x14ab   : > { %v2781_v31 = vmul.f32 0.03125, %v2775_v30 }
0x14ad   : > { %v2784_v38 = vsub.f32 %v2768_v19, %v2781_v31 }
0x14af   : > { %v2778_v32 = vpop.xlane.xlu0 %2777  ;;  %v2787_v33 = vmul.f32 %v2784_v38, %v2784_v38 }
0x14b0   : > { %v2782_v34 = vmul.f32 0.03125, %v2778_v32 }
0x14b1   : > { %v2792_v37 = vsel %vm424_vm1, %v2787_v33, 0.0 }
0x14b2   : > { %v2785_v28 = vsub.f32 %v2769_v26, %v2782_v34  ;;  %2793 = vadd.xlane.f32.xlu1 %v2792_v37 }
0x14b3   : > { %v2791_v35 = vpop.xlane.xlu0 %2790 }
0x14b4   : > { %v2798_v36 = vmul.f32 0.03125, %v2791_v35  ;;  %v2788_v39 = vmul.f32 %v2785_v28, %v2785_v28 }
0x14b6   : > { %v2801_v40 = vadd.f32 1e-05, %v2798_v36  ;;  %v2795_v42 = vsel %vm424_vm1, %v2788_v39, 0.0 }
0x14b7   : > { %2796 = vadd.xlane.f32.xlu0 %v2795_v42 }
0x14b8   : > { %3622 = vrsqrt.f32 %v2801_v40 }
0x14c2   : > { %v3623_v43 = vpop.eup %3622 }
0x14c3   : > { %v2807_v49 = vmul.f32 %v3623_v43, %v2783_v21 }
0x14c5   : > { %v2817_v51 = vmul.f32 %v2970_v48, %v2807_v49 }
0x14c7   : > { %v2827_v52 = vadd.f32 %v2971_v50, %v2817_v51 }
0x14c9   : > { %2830 = vst.msk [vmem:[%s415_s24] sm:$0xff] %vm424_vm1, %v2827_v52 }
0x153f   : > { %v2794_v1 = vpop.xlane.xlu1 %2793 }
0x1540   : > { %v2799_v41 = vmul.f32 0.03125, %v2794_v1 }
0x1542   : > { %v2802_v0 = vadd.f32 1e-05, %v2799_v41 }
0x1544   : > { %3624 = vrsqrt.f32 %v2802_v0  ;;  %v2797_v3 = vpop.xlane.xlu0 %2796 }
0x1545   : > { %v2800_v46 = vmul.f32 0.03125, %v2797_v3 }
0x1547   : > { %v2803_v23 = vadd.f32 1e-05, %v2800_v46 }
0x1549   : > { %3626 = vrsqrt.f32 %v2803_v23 }
0x154e   : > { %v3625_v45 = vpop.eup %3624 }
0x154f   : > { %v2808_v47 = vmul.f32 %v3625_v45, %v2784_v38 }
0x1551   : > { %v2818_v53 = vmul.f32 %v2970_v48, %v2808_v47 }
0x1553   : > { %v3627_v22 = vpop.eup %3626  ;;  %v2828_v44 = vadd.f32 %v2971_v50, %v2818_v53 }
0x1554   : > { %v2809_v54 = vmul.f32 %v3627_v22, %v2785_v28 }
0x1555   : > { %2831 = vst.msk [vmem:[%s415_s24 + $0x8] sm:$0xff] %vm424_vm1, %v2828_v44 }
0x1556   : > { %v2819_v55 = vmul.f32 %v2970_v48, %v2809_v54 }
0x1558   : > { %v2829_v57 = vadd.f32 %v2971_v50, %v2819_v55 }
0x155a   : > { %2832 = vst.msk [vmem:[%s415_s24 + $0x10] sm:$0xff] %vm424_vm1, %v2829_v57 }
0x155b PF: > { %s22_s21 = sadd.s32 1, %s3634_s21  }
0x155c   : > { %p19_p4 = scmp.ge.s32.totalorder %s22_s21, 5  }
0x155e   :  { %21 = sbr.rel (!%p19_p4) target bundleno = 1 (0x1), region = 98 }

</bundles_post_ra>
